<compile_context>
chip_gen: v6e
topology: v6e:2x2x1
jax: 0.10.0
libtpu: 0.0.40
codegen_flags: <defaults>
</compile_context>

<pallas_src>
import functools

import jax
import jax.numpy as jnp
import numpy as np
from jax import lax
from jax.experimental import pallas as pl
from jax.experimental.pallas import tpu as pltpu


# ----------------------------------------------------------------------------
# Fused Pallas kernel: all GRU layers + fc(relu(h_T)) in one invocation
# ----------------------------------------------------------------------------
def gru_net_kernel(xp_ref, h0_ref, wih_ref, whh_ref, bih_ref, bhh_ref,
                   fcw_ref, fcb_ref, out_ref, hT_ref, act_scr, gi_scr):
    """Fused multi-layer GRU + Linear head.

    xp_ref  : (T, B, H)   time-major input, zero-padded from D to H lanes
    h0_ref  : (L, B, H)   initial hidden states
    wih_ref : (L, H, 3H)  W_ih^T per layer (layer 0 zero-padded in rows D..H)
    whh_ref : (L, H, 3H)  W_hh^T per layer
    bih_ref : (L, 1, 3H)
    bhh_ref : (L, 1, 3H)
    fcw_ref : (H, O)      fc weight, transposed
    fcb_ref : (1, O)
    out_ref : (B, O)      fc(relu(h_T of last layer))
    hT_ref  : (L, B, H)   final hidden state per layer
    act_scr : VMEM (T, B, H)   inter-layer activations (never leaves VMEM)
    gi_scr  : VMEM (T, B, 3H)  hoisted input-projection for all timesteps
    """
    T, B, H = act_scr.shape
    L = h0_ref.shape[0]
    G = 3 * H

    # Layer-0 "activations" are the (padded) input sequence.
    act_scr[...] = xp_ref[...]

    h_last = None
    for l in range(L):                       # static unroll over layers
        # --- Hoisted, non-recurrent input projection for ALL timesteps -----
        x_all = act_scr[...].reshape(T * B, H)                    # (T*B, H)
        gi = jnp.dot(x_all, wih_ref[l],
                     preferred_element_type=jnp.float32) + bih_ref[l]
        gi_scr[...] = gi.reshape(T, B, G)

        # --- Sequential recurrence: only h_prev @ W_hh remains inside ------
        def step(t, h, l=l, H=H):
            gi_t = gi_scr[t]                                      # (B, 3H)
            gh = jnp.dot(h, whh_ref[l],
                         preferred_element_type=jnp.float32) + bhh_ref[l]
            # PyTorch gate order: r, z, n
            r = jax.nn.sigmoid(gi_t[:, :H] + gh[:, :H])
            z = jax.nn.sigmoid(gi_t[:, H:2 * H] + gh[:, H:2 * H])
            n = jnp.tanh(gi_t[:, 2 * H:] + r * gh[:, 2 * H:])
            h_new = (1.0 - z) * n + z * h
            if l < L - 1:                    # last layer's per-step outputs
                act_scr[t] = h_new           # are only needed as h_T
            return h_new

        h_last = lax.fori_loop(0, T, step, h0_ref[l], unroll=True)
        hT_ref[l] = h_last.astype(hT_ref.dtype)

    # --- fc(relu(out[:, -1]))  ==  fc(relu(h_T of last layer)) -------------
    out_ref[...] = (jnp.dot(jnp.maximum(h_last, 0.0), fcw_ref[...],
                            preferred_element_type=jnp.float32)
                    + fcb_ref[...]).astype(out_ref.dtype)


# ----------------------------------------------------------------------------
# Wrappers
# ----------------------------------------------------------------------------
def prepare_params(params, input_dim, hidden_dim):
    """One-time re-layout of PyTorch-style parameters (done outside forward)."""
    H = hidden_dim
    assert input_dim <= H, "layer-0 input dim must fit in the padded H lanes"
    wih_s, whh_s, bih_s, bhh_s = [], [], [], []
    for l, p in enumerate(params["gru"]):
        d_in = input_dim if l == 0 else H
        wih_t = jnp.transpose(p["wih"])                       # (d_in, 3H)
        if d_in < H:
            wih_t = jnp.pad(wih_t, ((0, H - d_in), (0, 0)))   # zero rows
        wih_s.append(wih_t)
        whh_s.append(jnp.transpose(p["whh"]))                 # (H, 3H)
        bih_s.append(p["bih"].reshape(1, 3 * H))
        bhh_s.append(p["bhh"].reshape(1, 3 * H))
    return {
        "wih": jnp.stack(wih_s),                              # (L, H, 3H)
        "whh": jnp.stack(whh_s),                              # (L, H, 3H)
        "bih": jnp.stack(bih_s),                              # (L, 1, 3H)
        "bhh": jnp.stack(bhh_s),                              # (L, 1, 3H)
        "fc_w": jnp.transpose(params["fc_w"]),                # (H, O)
        "fc_b": params["fc_b"].reshape(1, -1),                # (1, O)
    }


@functools.partial(jax.jit, static_argnames=())
def gru_net_forward(x, h0, prepped):
    """Pallas implementation of GRUNet.forward (inference semantics).

    x : (B, T, D) batch_first, float32
    h0: (L, B, H)
    Returns (out (B, O), h (L, B, H)).
    """
    B, T, D = x.shape
    L, _, H = h0.shape
    O = prepped["fc_w"].shape[1]

    x_tm = jnp.transpose(x, (1, 0, 2))                       # (T, B, D)
    xp = jnp.pad(x_tm, ((0, 0), (0, 0), (0, H - D)))         # (T, B, H)

    out, hT = pl.pallas_call(
        gru_net_kernel,
        out_shape=(
            jax.ShapeDtypeStruct((B, O), jnp.float32),
            jax.ShapeDtypeStruct((L, B, H), jnp.float32),
        ),
        in_specs=[
            pl.BlockSpec((T, B, H), lambda: (0, 0, 0)),
            pl.BlockSpec((L, B, H), lambda: (0, 0, 0)),
            pl.BlockSpec((L, H, 3 * H), lambda: (0, 0, 0)),
            pl.BlockSpec((L, H, 3 * H), lambda: (0, 0, 0)),
            pl.BlockSpec((L, 1, 3 * H), lambda: (0, 0, 0)),
            pl.BlockSpec((L, 1, 3 * H), lambda: (0, 0, 0)),
            pl.BlockSpec((H, O), lambda: (0, 0)),
            pl.BlockSpec((1, O), lambda: (0, 0)),
        ],
        out_specs=(
            pl.BlockSpec((B, O), lambda: (0, 0)),
            pl.BlockSpec((L, B, H), lambda: (0, 0, 0)),
        ),
        scratch_shapes=[
            pltpu.VMEM((T, B, H), jnp.float32),
            pltpu.VMEM((T, B, 3 * H), jnp.float32),
        ],
    )(xp, h0, prepped["wih"], prepped["whh"], prepped["bih"], prepped["bhh"],
      prepped["fc_w"], prepped["fc_b"])
    return out, hT


# ----------------------------------------------------------------------------
# Pure-JAX reference (PyTorch GRU semantics) for verification
# ----------------------------------------------------------------------------
def gru_net_reference(x, h0, params):
    B, T, D = x.shape
    inp = x
    h_finals = []
    for l, p in enumerate(params["gru"]):
        H = p["whh"].shape[1]
        h = h0[l]
        outs = []
        for t in range(T):
            x_t = inp[:, t, :]
            gi = x_t @ p["wih"].T + p["bih"]
            gh = h @ p["whh"].T + p["bhh"]
            i_r, i_z, i_n = gi[:, :H], gi[:, H:2 * H], gi[:, 2 * H:]
            h_r, h_z, h_n = gh[:, :H], gh[:, H:2 * H], gh[:, 2 * H:]
            r = jax.nn.sigmoid(i_r + h_r)
            z = jax.nn.sigmoid(i_z + h_z)
            n = jnp.tanh(i_n + r * h_n)
            h = (1.0 - z) * n + z * h
            outs.append(h)
        inp = jnp.stack(outs, axis=1)
        h_finals.append(h)
    h_out = jnp.stack(h_finals, axis=0)
    out = jnp.maximum(inp[:, -1], 0.0) @ params["fc_w"].T + params["fc_b"]
    return out, h_out


# ----------------------------------------------------------------------------
# Deterministic parameter init (PyTorch-style uniform(-1/sqrt(H), 1/sqrt(H)))
# ----------------------------------------------------------------------------
def init_params(key, input_dim, hidden_dim, output_dim, n_layers):
    k = 1.0 / np.sqrt(hidden_dim)
    params = {"gru": []}
    for l in range(n_layers):
        d_in = input_dim if l == 0 else hidden_dim
        key, k1, k2, k3, k4 = jax.random.split(key, 5)
        params["gru"].append({
            "wih": jax.random.uniform(k1, (3 * hidden_dim, d_in), jnp.float32, -k, k),
            "whh": jax.random.uniform(k2, (3 * hidden_dim, hidden_dim), jnp.float32, -k, k),
            "bih": jax.random.uniform(k3, (3 * hidden_dim,), jnp.float32, -k, k),
            "bhh": jax.random.uniform(k4, (3 * hidden_dim,), jnp.float32, -k, k),
        })
    key, k1, k2 = jax.random.split(key, 3)
    kf = 1.0 / np.sqrt(hidden_dim)
    params["fc_w"] = jax.random.uniform(k1, (output_dim, hidden_dim), jnp.float32, -kf, kf)
    params["fc_b"] = jax.random.uniform(k2, (output_dim,), jnp.float32, -kf, kf)
    return params


if __name__ == "__main__":
    # "2 features predict 1 output": input_dim=2, output_dim=1
    B, T, D = 8, 8, 2          # B=8 keeps sublane-aligned (T,B,H) layouts
    H, O, n_layers = 32, 1, 2

    key = jax.random.PRNGKey(0)
    key, kx = jax.random.split(key)
    x = jax.random.normal(kx, (B, T, D), jnp.float32)
    h0 = jnp.zeros((n_layers, B, H), jnp.float32)      # init_hidden()
    params = init_params(key, D, H, O, n_layers)
    prepped = prepare_params(params, D, H)             # one-time re-layout

    out, h = gru_net_forward(x, h0, prepped)
    jax.block_until_ready((out, h))

    out_ref, h_ref = gru_net_reference(x, h0, params)
    np.testing.assert_allclose(np.asarray(out), np.asarray(out_ref), rtol=1e-5, atol=1e-5)
    np.testing.assert_allclose(np.asarray(h), np.asarray(h_ref), rtol=1e-5, atol=1e-5)

    assert out.shape == (B, O) and h.shape == (n_layers, B, H)
    print("KERNEL_OK")
</pallas_src>

<mosaic_0001>
module attributes {stable_mosaic.version = 11 : i64} {
  func.func @gru_net_kernel(%arg0: memref<8x8x32xf32, #tpu.memory_space<vmem>>, %arg1: memref<2x8x32xf32, #tpu.memory_space<vmem>>, %arg2: memref<2x32x96xf32, #tpu.memory_space<vmem>>, %arg3: memref<2x32x96xf32, #tpu.memory_space<vmem>>, %arg4: memref<2x1x96xf32, #tpu.memory_space<vmem>>, %arg5: memref<2x1x96xf32, #tpu.memory_space<vmem>>, %arg6: memref<32x1xf32, #tpu.memory_space<vmem>>, %arg7: memref<1x1xf32, #tpu.memory_space<vmem>>, %arg8: memref<8x1xf32, #tpu.memory_space<vmem>>, %arg9: memref<2x8x32xf32, #tpu.memory_space<vmem>>, %arg10: memref<8x8x32xf32, #tpu.memory_space<vmem>>, %arg11: memref<8x8x96xf32, #tpu.memory_space<vmem>>) attributes {dimension_semantics = [], scalar_prefetch = 0 : i64, scratch_operands = 2 : i64, tpu.core_type = #tpu.core_type<tc>} {
    %c0 = arith.constant 0 : index
    %c0_0 = arith.constant 0 : index
    %c0_1 = arith.constant 0 : index
    %0 = vector.load %arg0[%c0, %c0_0, %c0_1] : memref<8x8x32xf32, #tpu.memory_space<vmem>>, vector<8x8x32xf32>
    %c0_2 = arith.constant 0 : index
    %c0_3 = arith.constant 0 : index
    %c0_4 = arith.constant 0 : index
    %1 = vector.load %arg10[%c0_2, %c0_3, %c0_4] : memref<8x8x32xf32, #tpu.memory_space<vmem>>, vector<8x8x32xf32>
    tpu.vector_store %arg10[%c0_2, %c0_3, %c0_4], %0 {strides = array<i32>} : memref<8x8x32xf32, #tpu.memory_space<vmem>>, vector<8x8x32xf32>,
    %c0_5 = arith.constant 0 : index
    %c0_6 = arith.constant 0 : index
    %c0_7 = arith.constant 0 : index
    %2 = vector.load %arg10[%c0_5, %c0_6, %c0_7] : memref<8x8x32xf32, #tpu.memory_space<vmem>>, vector<8x8x32xf32>
    %3 = vector.shape_cast %2 : vector<8x8x32xf32> to vector<64x32xf32>
    %c0_8 = arith.constant 0 : index
    %c0_9 = arith.constant 0 : index
    %c0_10 = arith.constant 0 : index
    %4 = vector.load %arg2[%c0_8, %c0_9, %c0_10] : memref<2x32x96xf32, #tpu.memory_space<vmem>>, vector<1x32x96xf32>
    %5 = vector.shape_cast %4 : vector<1x32x96xf32> to vector<32x96xf32>
    %cst = arith.constant dense<0.000000e+00> : vector<64x96xf32>
    %6 = tpu.matmul %3, %5, %cst {dimension_numbers = #tpu.dot_dimension_numbers<[1], [0], [0], [1], [0, 0, 1, 1], [], []>} : vector<64x32xf32>, vector<32x96xf32>, vector<64x96xf32> -> vector<64x96xf32>
    %c0_11 = arith.constant 0 : index
    %c0_12 = arith.constant 0 : index
    %c0_13 = arith.constant 0 : index
    %7 = vector.load %arg4[%c0_11, %c0_12, %c0_13] : memref<2x1x96xf32, #tpu.memory_space<vmem>>, vector<1x1x96xf32>
    %8 = vector.shape_cast %7 : vector<1x1x96xf32> to vector<1x96xf32>
    %9 = vector.broadcast %8 : vector<1x96xf32> to vector<64x96xf32>
    %10 = arith.addf %6, %9 : vector<64x96xf32>
    %11 = vector.shape_cast %10 : vector<64x96xf32> to vector<8x8x96xf32>
    %c0_14 = arith.constant 0 : index
    %c0_15 = arith.constant 0 : index
    %c0_16 = arith.constant 0 : index
    %12 = vector.load %arg11[%c0_14, %c0_15, %c0_16] : memref<8x8x96xf32, #tpu.memory_space<vmem>>, vector<8x8x96xf32>
    tpu.vector_store %arg11[%c0_14, %c0_15, %c0_16], %11 {strides = array<i32>} : memref<8x8x96xf32, #tpu.memory_space<vmem>>, vector<8x8x96xf32>,
    %c0_17 = arith.constant 0 : index
    %c0_18 = arith.constant 0 : index
    %c0_19 = arith.constant 0 : index
    %13 = vector.load %arg1[%c0_17, %c0_18, %c0_19] : memref<2x8x32xf32, #tpu.memory_space<vmem>>, vector<1x8x32xf32>
    %14 = vector.shape_cast %13 : vector<1x8x32xf32> to vector<8x32xf32>
    %c0_i32 = arith.constant 0 : i32
    %15 = arith.index_cast %c0_i32 : i32 to index
    %c0_20 = arith.constant 0 : index
    %c0_21 = arith.constant 0 : index
    %16 = vector.load %arg11[%15, %c0_20, %c0_21] : memref<8x8x96xf32, #tpu.memory_space<vmem>>, vector<1x8x96xf32>
    %17 = vector.shape_cast %16 : vector<1x8x96xf32> to vector<8x96xf32>
    %c0_22 = arith.constant 0 : index
    %c0_23 = arith.constant 0 : index
    %c0_24 = arith.constant 0 : index
    %18 = vector.load %arg3[%c0_22, %c0_23, %c0_24] : memref<2x32x96xf32, #tpu.memory_space<vmem>>, vector<1x32x96xf32>
    %19 = vector.shape_cast %18 : vector<1x32x96xf32> to vector<32x96xf32>
    %cst_25 = arith.constant dense<0.000000e+00> : vector<8x96xf32>
    %20 = tpu.matmul %14, %19, %cst_25 {dimension_numbers = #tpu.dot_dimension_numbers<[1], [0], [0], [1], [0, 0, 1, 1], [], []>} : vector<8x32xf32>, vector<32x96xf32>, vector<8x96xf32> -> vector<8x96xf32>
    %c0_26 = arith.constant 0 : index
    %c0_27 = arith.constant 0 : index
    %c0_28 = arith.constant 0 : index
    %21 = vector.load %arg5[%c0_26, %c0_27, %c0_28] : memref<2x1x96xf32, #tpu.memory_space<vmem>>, vector<1x1x96xf32>
    %22 = vector.shape_cast %21 : vector<1x1x96xf32> to vector<1x96xf32>
    %23 = vector.broadcast %22 : vector<1x96xf32> to vector<8x96xf32>
    %24 = arith.addf %20, %23 : vector<8x96xf32>
    %25 = vector.extract_strided_slice %17 {offsets = [0, 0], sizes = [8, 32], strides = [1, 1]} : vector<8x96xf32> to vector<8x32xf32>
    %26 = vector.extract_strided_slice %24 {offsets = [0, 0], sizes = [8, 32], strides = [1, 1]} : vector<8x96xf32> to vector<8x32xf32>
    %27 = arith.addf %25, %26 : vector<8x32xf32>
    %28 = arith.negf %27 : vector<8x32xf32>
    %29 = math.exp %28 : vector<8x32xf32>
    %cst_29 = arith.constant 1.000000e+00 : f32
    %30 = vector.broadcast %cst_29 : f32 to vector<8x32xf32>
    %31 = arith.addf %30, %29 : vector<8x32xf32>
    %32 = arith.divf %30, %31 : vector<8x32xf32>
    %33 = vector.extract_strided_slice %17 {offsets = [0, 32], sizes = [8, 32], strides = [1, 1]} : vector<8x96xf32> to vector<8x32xf32>
    %34 = vector.extract_strided_slice %24 {offsets = [0, 32], sizes = [8, 32], strides = [1, 1]} : vector<8x96xf32> to vector<8x32xf32>
    %35 = arith.addf %33, %34 : vector<8x32xf32>
    %36 = arith.negf %35 : vector<8x32xf32>
    %37 = math.exp %36 : vector<8x32xf32>
    %cst_30 = arith.constant 1.000000e+00 : f32
    %38 = vector.broadcast %cst_30 : f32 to vector<8x32xf32>
    %39 = arith.addf %38, %37 : vector<8x32xf32>
    %40 = arith.divf %38, %39 : vector<8x32xf32>
    %41 = vector.extract_strided_slice %17 {offsets = [0, 64], sizes = [8, 32], strides = [1, 1]} : vector<8x96xf32> to vector<8x32xf32>
    %42 = vector.extract_strided_slice %24 {offsets = [0, 64], sizes = [8, 32], strides = [1, 1]} : vector<8x96xf32> to vector<8x32xf32>
    %43 = arith.mulf %32, %42 : vector<8x32xf32>
    %44 = arith.addf %41, %43 : vector<8x32xf32>
    %45 = math.tanh %44 : vector<8x32xf32>
    %cst_31 = arith.constant 1.000000e+00 : f32
    %46 = vector.broadcast %cst_31 : f32 to vector<8x32xf32>
    %47 = arith.subf %46, %40 : vector<8x32xf32>
    %48 = arith.mulf %47, %45 : vector<8x32xf32>
    %49 = arith.mulf %40, %14 : vector<8x32xf32>
    %50 = arith.addf %48, %49 : vector<8x32xf32>
    %51 = arith.index_cast %c0_i32 : i32 to index
    %c0_32 = arith.constant 0 : index
    %c0_33 = arith.constant 0 : index
    %52 = vector.load %arg10[%51, %c0_32, %c0_33] : memref<8x8x32xf32, #tpu.memory_space<vmem>>, vector<1x8x32xf32>
    %53 = vector.shape_cast %52 : vector<1x8x32xf32> to vector<8x32xf32>
    %54 = vector.shape_cast %50 : vector<8x32xf32> to vector<1x8x32xf32>
    tpu.vector_store %arg10[%51, %c0_32, %c0_33], %54 {strides = array<i32>} : memref<8x8x32xf32, #tpu.memory_space<vmem>>, vector<1x8x32xf32>,
    %c1_i32 = arith.constant 1 : i32
    %55 = arith.index_cast %c1_i32 : i32 to index
    %c0_34 = arith.constant 0 : index
    %c0_35 = arith.constant 0 : index
    %56 = vector.load %arg11[%55, %c0_34, %c0_35] : memref<8x8x96xf32, #tpu.memory_space<vmem>>, vector<1x8x96xf32>
    %57 = vector.shape_cast %56 : vector<1x8x96xf32> to vector<8x96xf32>
    %c0_36 = arith.constant 0 : index
    %c0_37 = arith.constant 0 : index
    %c0_38 = arith.constant 0 : index
    %58 = vector.load %arg3[%c0_36, %c0_37, %c0_38] : memref<2x32x96xf32, #tpu.memory_space<vmem>>, vector<1x32x96xf32>
    %59 = vector.shape_cast %58 : vector<1x32x96xf32> to vector<32x96xf32>
    %cst_39 = arith.constant dense<0.000000e+00> : vector<8x96xf32>
    %60 = tpu.matmul %50, %59, %cst_39 {dimension_numbers = #tpu.dot_dimension_numbers<[1], [0], [0], [1], [0, 0, 1, 1], [], []>} : vector<8x32xf32>, vector<32x96xf32>, vector<8x96xf32> -> vector<8x96xf32>
    %c0_40 = arith.constant 0 : index
    %c0_41 = arith.constant 0 : index
    %c0_42 = arith.constant 0 : index
    %61 = vector.load %arg5[%c0_40, %c0_41, %c0_42] : memref<2x1x96xf32, #tpu.memory_space<vmem>>, vector<1x1x96xf32>
    %62 = vector.shape_cast %61 : vector<1x1x96xf32> to vector<1x96xf32>
    %63 = vector.broadcast %62 : vector<1x96xf32> to vector<8x96xf32>
    %64 = arith.addf %60, %63 : vector<8x96xf32>
    %65 = vector.extract_strided_slice %57 {offsets = [0, 0], sizes = [8, 32], strides = [1, 1]} : vector<8x96xf32> to vector<8x32xf32>
    %66 = vector.extract_strided_slice %64 {offsets = [0, 0], sizes = [8, 32], strides = [1, 1]} : vector<8x96xf32> to vector<8x32xf32>
    %67 = arith.addf %65, %66 : vector<8x32xf32>
    %68 = arith.negf %67 : vector<8x32xf32>
    %69 = math.exp %68 : vector<8x32xf32>
    %cst_43 = arith.constant 1.000000e+00 : f32
    %70 = vector.broadcast %cst_43 : f32 to vector<8x32xf32>
    %71 = arith.addf %70, %69 : vector<8x32xf32>
    %72 = arith.divf %70, %71 : vector<8x32xf32>
    %73 = vector.extract_strided_slice %57 {offsets = [0, 32], sizes = [8, 32], strides = [1, 1]} : vector<8x96xf32> to vector<8x32xf32>
    %74 = vector.extract_strided_slice %64 {offsets = [0, 32], sizes = [8, 32], strides = [1, 1]} : vector<8x96xf32> to vector<8x32xf32>
    %75 = arith.addf %73, %74 : vector<8x32xf32>
    %76 = arith.negf %75 : vector<8x32xf32>
    %77 = math.exp %76 : vector<8x32xf32>
    %cst_44 = arith.constant 1.000000e+00 : f32
    %78 = vector.broadcast %cst_44 : f32 to vector<8x32xf32>
    %79 = arith.addf %78, %77 : vector<8x32xf32>
    %80 = arith.divf %78, %79 : vector<8x32xf32>
    %81 = vector.extract_strided_slice %57 {offsets = [0, 64], sizes = [8, 32], strides = [1, 1]} : vector<8x96xf32> to vector<8x32xf32>
    %82 = vector.extract_strided_slice %64 {offsets = [0, 64], sizes = [8, 32], strides = [1, 1]} : vector<8x96xf32> to vector<8x32xf32>
    %83 = arith.mulf %72, %82 : vector<8x32xf32>
    %84 = arith.addf %81, %83 : vector<8x32xf32>
    %85 = math.tanh %84 : vector<8x32xf32>
    %cst_45 = arith.constant 1.000000e+00 : f32
    %86 = vector.broadcast %cst_45 : f32 to vector<8x32xf32>
    %87 = arith.subf %86, %80 : vector<8x32xf32>
    %88 = arith.mulf %87, %85 : vector<8x32xf32>
    %89 = arith.mulf %80, %50 : vector<8x32xf32>
    %90 = arith.addf %88, %89 : vector<8x32xf32>
    %91 = arith.index_cast %c1_i32 : i32 to index
    %c0_46 = arith.constant 0 : index
    %c0_47 = arith.constant 0 : index
    %92 = vector.load %arg10[%91, %c0_46, %c0_47] : memref<8x8x32xf32, #tpu.memory_space<vmem>>, vector<1x8x32xf32>
    %93 = vector.shape_cast %92 : vector<1x8x32xf32> to vector<8x32xf32>
    %94 = vector.shape_cast %90 : vector<8x32xf32> to vector<1x8x32xf32>
    tpu.vector_store %arg10[%91, %c0_46, %c0_47], %94 {strides = array<i32>} : memref<8x8x32xf32, #tpu.memory_space<vmem>>, vector<1x8x32xf32>,
    %c2_i32 = arith.constant 2 : i32
    %95 = arith.index_cast %c2_i32 : i32 to index
    %c0_48 = arith.constant 0 : index
    %c0_49 = arith.constant 0 : index
    %96 = vector.load %arg11[%95, %c0_48, %c0_49] : memref<8x8x96xf32, #tpu.memory_space<vmem>>, vector<1x8x96xf32>
    %97 = vector.shape_cast %96 : vector<1x8x96xf32> to vector<8x96xf32>
    %c0_50 = arith.constant 0 : index
    %c0_51 = arith.constant 0 : index
    %c0_52 = arith.constant 0 : index
    %98 = vector.load %arg3[%c0_50, %c0_51, %c0_52] : memref<2x32x96xf32, #tpu.memory_space<vmem>>, vector<1x32x96xf32>
    %99 = vector.shape_cast %98 : vector<1x32x96xf32> to vector<32x96xf32>
    %cst_53 = arith.constant dense<0.000000e+00> : vector<8x96xf32>
    %100 = tpu.matmul %90, %99, %cst_53 {dimension_numbers = #tpu.dot_dimension_numbers<[1], [0], [0], [1], [0, 0, 1, 1], [], []>} : vector<8x32xf32>, vector<32x96xf32>, vector<8x96xf32> -> vector<8x96xf32>
    %c0_54 = arith.constant 0 : index
    %c0_55 = arith.constant 0 : index
    %c0_56 = arith.constant 0 : index
    %101 = vector.load %arg5[%c0_54, %c0_55, %c0_56] : memref<2x1x96xf32, #tpu.memory_space<vmem>>, vector<1x1x96xf32>
    %102 = vector.shape_cast %101 : vector<1x1x96xf32> to vector<1x96xf32>
    %103 = vector.broadcast %102 : vector<1x96xf32> to vector<8x96xf32>
    %104 = arith.addf %100, %103 : vector<8x96xf32>
    %105 = vector.extract_strided_slice %97 {offsets = [0, 0], sizes = [8, 32], strides = [1, 1]} : vector<8x96xf32> to vector<8x32xf32>
    %106 = vector.extract_strided_slice %104 {offsets = [0, 0], sizes = [8, 32], strides = [1, 1]} : vector<8x96xf32> to vector<8x32xf32>
    %107 = arith.addf %105, %106 : vector<8x32xf32>
    %108 = arith.negf %107 : vector<8x32xf32>
    %109 = math.exp %108 : vector<8x32xf32>
    %cst_57 = arith.constant 1.000000e+00 : f32
    %110 = vector.broadcast %cst_57 : f32 to vector<8x32xf32>
    %111 = arith.addf %110, %109 : vector<8x32xf32>
    %112 = arith.divf %110, %111 : vector<8x32xf32>
    %113 = vector.extract_strided_slice %97 {offsets = [0, 32], sizes = [8, 32], strides = [1, 1]} : vector<8x96xf32> to vector<8x32xf32>
    %114 = vector.extract_strided_slice %104 {offsets = [0, 32], sizes = [8, 32], strides = [1, 1]} : vector<8x96xf32> to vector<8x32xf32>
    %115 = arith.addf %113, %114 : vector<8x32xf32>
    %116 = arith.negf %115 : vector<8x32xf32>
    %117 = math.exp %116 : vector<8x32xf32>
    %cst_58 = arith.constant 1.000000e+00 : f32
    %118 = vector.broadcast %cst_58 : f32 to vector<8x32xf32>
    %119 = arith.addf %118, %117 : vector<8x32xf32>
    %120 = arith.divf %118, %119 : vector<8x32xf32>
    %121 = vector.extract_strided_slice %97 {offsets = [0, 64], sizes = [8, 32], strides = [1, 1]} : vector<8x96xf32> to vector<8x32xf32>
    %122 = vector.extract_strided_slice %104 {offsets = [0, 64], sizes = [8, 32], strides = [1, 1]} : vector<8x96xf32> to vector<8x32xf32>
    %123 = arith.mulf %112, %122 : vector<8x32xf32>
    %124 = arith.addf %121, %123 : vector<8x32xf32>
    %125 = math.tanh %124 : vector<8x32xf32>
    %cst_59 = arith.constant 1.000000e+00 : f32
    %126 = vector.broadcast %cst_59 : f32 to vector<8x32xf32>
    %127 = arith.subf %126, %120 : vector<8x32xf32>
    %128 = arith.mulf %127, %125 : vector<8x32xf32>
    %129 = arith.mulf %120, %90 : vector<8x32xf32>
    %130 = arith.addf %128, %129 : vector<8x32xf32>
    %131 = arith.index_cast %c2_i32 : i32 to index
    %c0_60 = arith.constant 0 : index
    %c0_61 = arith.constant 0 : index
    %132 = vector.load %arg10[%131, %c0_60, %c0_61] : memref<8x8x32xf32, #tpu.memory_space<vmem>>, vector<1x8x32xf32>
    %133 = vector.shape_cast %132 : vector<1x8x32xf32> to vector<8x32xf32>
    %134 = vector.shape_cast %130 : vector<8x32xf32> to vector<1x8x32xf32>
    tpu.vector_store %arg10[%131, %c0_60, %c0_61], %134 {strides = array<i32>} : memref<8x8x32xf32, #tpu.memory_space<vmem>>, vector<1x8x32xf32>,
    %c3_i32 = arith.constant 3 : i32
    %135 = arith.index_cast %c3_i32 : i32 to index
    %c0_62 = arith.constant 0 : index
    %c0_63 = arith.constant 0 : index
    %136 = vector.load %arg11[%135, %c0_62, %c0_63] : memref<8x8x96xf32, #tpu.memory_space<vmem>>, vector<1x8x96xf32>
    %137 = vector.shape_cast %136 : vector<1x8x96xf32> to vector<8x96xf32>
    %c0_64 = arith.constant 0 : index
    %c0_65 = arith.constant 0 : index
    %c0_66 = arith.constant 0 : index
    %138 = vector.load %arg3[%c0_64, %c0_65, %c0_66] : memref<2x32x96xf32, #tpu.memory_space<vmem>>, vector<1x32x96xf32>
    %139 = vector.shape_cast %138 : vector<1x32x96xf32> to vector<32x96xf32>
    %cst_67 = arith.constant dense<0.000000e+00> : vector<8x96xf32>
    %140 = tpu.matmul %130, %139, %cst_67 {dimension_numbers = #tpu.dot_dimension_numbers<[1], [0], [0], [1], [0, 0, 1, 1], [], []>} : vector<8x32xf32>, vector<32x96xf32>, vector<8x96xf32> -> vector<8x96xf32>
    %c0_68 = arith.constant 0 : index
    %c0_69 = arith.constant 0 : index
    %c0_70 = arith.constant 0 : index
    %141 = vector.load %arg5[%c0_68, %c0_69, %c0_70] : memref<2x1x96xf32, #tpu.memory_space<vmem>>, vector<1x1x96xf32>
    %142 = vector.shape_cast %141 : vector<1x1x96xf32> to vector<1x96xf32>
    %143 = vector.broadcast %142 : vector<1x96xf32> to vector<8x96xf32>
    %144 = arith.addf %140, %143 : vector<8x96xf32>
    %145 = vector.extract_strided_slice %137 {offsets = [0, 0], sizes = [8, 32], strides = [1, 1]} : vector<8x96xf32> to vector<8x32xf32>
    %146 = vector.extract_strided_slice %144 {offsets = [0, 0], sizes = [8, 32], strides = [1, 1]} : vector<8x96xf32> to vector<8x32xf32>
    %147 = arith.addf %145, %146 : vector<8x32xf32>
    %148 = arith.negf %147 : vector<8x32xf32>
    %149 = math.exp %148 : vector<8x32xf32>
    %cst_71 = arith.constant 1.000000e+00 : f32
    %150 = vector.broadcast %cst_71 : f32 to vector<8x32xf32>
    %151 = arith.addf %150, %149 : vector<8x32xf32>
    %152 = arith.divf %150, %151 : vector<8x32xf32>
    %153 = vector.extract_strided_slice %137 {offsets = [0, 32], sizes = [8, 32], strides = [1, 1]} : vector<8x96xf32> to vector<8x32xf32>
    %154 = vector.extract_strided_slice %144 {offsets = [0, 32], sizes = [8, 32], strides = [1, 1]} : vector<8x96xf32> to vector<8x32xf32>
    %155 = arith.addf %153, %154 : vector<8x32xf32>
    %156 = arith.negf %155 : vector<8x32xf32>
    %157 = math.exp %156 : vector<8x32xf32>
    %cst_72 = arith.constant 1.000000e+00 : f32
    %158 = vector.broadcast %cst_72 : f32 to vector<8x32xf32>
    %159 = arith.addf %158, %157 : vector<8x32xf32>
    %160 = arith.divf %158, %159 : vector<8x32xf32>
    %161 = vector.extract_strided_slice %137 {offsets = [0, 64], sizes = [8, 32], strides = [1, 1]} : vector<8x96xf32> to vector<8x32xf32>
    %162 = vector.extract_strided_slice %144 {offsets = [0, 64], sizes = [8, 32], strides = [1, 1]} : vector<8x96xf32> to vector<8x32xf32>
    %163 = arith.mulf %152, %162 : vector<8x32xf32>
    %164 = arith.addf %161, %163 : vector<8x32xf32>
    %165 = math.tanh %164 : vector<8x32xf32>
    %cst_73 = arith.constant 1.000000e+00 : f32
    %166 = vector.broadcast %cst_73 : f32 to vector<8x32xf32>
    %167 = arith.subf %166, %160 : vector<8x32xf32>
    %168 = arith.mulf %167, %165 : vector<8x32xf32>
    %169 = arith.mulf %160, %130 : vector<8x32xf32>
    %170 = arith.addf %168, %169 : vector<8x32xf32>
    %171 = arith.index_cast %c3_i32 : i32 to index
    %c0_74 = arith.constant 0 : index
    %c0_75 = arith.constant 0 : index
    %172 = vector.load %arg10[%171, %c0_74, %c0_75] : memref<8x8x32xf32, #tpu.memory_space<vmem>>, vector<1x8x32xf32>
    %173 = vector.shape_cast %172 : vector<1x8x32xf32> to vector<8x32xf32>
    %174 = vector.shape_cast %170 : vector<8x32xf32> to vector<1x8x32xf32>
    tpu.vector_store %arg10[%171, %c0_74, %c0_75], %174 {strides = array<i32>} : memref<8x8x32xf32, #tpu.memory_space<vmem>>, vector<1x8x32xf32>,
    %c4_i32 = arith.constant 4 : i32
    %175 = arith.index_cast %c4_i32 : i32 to index
    %c0_76 = arith.constant 0 : index
    %c0_77 = arith.constant 0 : index
    %176 = vector.load %arg11[%175, %c0_76, %c0_77] : memref<8x8x96xf32, #tpu.memory_space<vmem>>, vector<1x8x96xf32>
    %177 = vector.shape_cast %176 : vector<1x8x96xf32> to vector<8x96xf32>
    %c0_78 = arith.constant 0 : index
    %c0_79 = arith.constant 0 : index
    %c0_80 = arith.constant 0 : index
    %178 = vector.load %arg3[%c0_78, %c0_79, %c0_80] : memref<2x32x96xf32, #tpu.memory_space<vmem>>, vector<1x32x96xf32>
    %179 = vector.shape_cast %178 : vector<1x32x96xf32> to vector<32x96xf32>
    %cst_81 = arith.constant dense<0.000000e+00> : vector<8x96xf32>
    %180 = tpu.matmul %170, %179, %cst_81 {dimension_numbers = #tpu.dot_dimension_numbers<[1], [0], [0], [1], [0, 0, 1, 1], [], []>} : vector<8x32xf32>, vector<32x96xf32>, vector<8x96xf32> -> vector<8x96xf32>
    %c0_82 = arith.constant 0 : index
    %c0_83 = arith.constant 0 : index
    %c0_84 = arith.constant 0 : index
    %181 = vector.load %arg5[%c0_82, %c0_83, %c0_84] : memref<2x1x96xf32, #tpu.memory_space<vmem>>, vector<1x1x96xf32>
    %182 = vector.shape_cast %181 : vector<1x1x96xf32> to vector<1x96xf32>
    %183 = vector.broadcast %182 : vector<1x96xf32> to vector<8x96xf32>
    %184 = arith.addf %180, %183 : vector<8x96xf32>
    %185 = vector.extract_strided_slice %177 {offsets = [0, 0], sizes = [8, 32], strides = [1, 1]} : vector<8x96xf32> to vector<8x32xf32>
    %186 = vector.extract_strided_slice %184 {offsets = [0, 0], sizes = [8, 32], strides = [1, 1]} : vector<8x96xf32> to vector<8x32xf32>
    %187 = arith.addf %185, %186 : vector<8x32xf32>
    %188 = arith.negf %187 : vector<8x32xf32>
    %189 = math.exp %188 : vector<8x32xf32>
    %cst_85 = arith.constant 1.000000e+00 : f32
    %190 = vector.broadcast %cst_85 : f32 to vector<8x32xf32>
    %191 = arith.addf %190, %189 : vector<8x32xf32>
    %192 = arith.divf %190, %191 : vector<8x32xf32>
    %193 = vector.extract_strided_slice %177 {offsets = [0, 32], sizes = [8, 32], strides = [1, 1]} : vector<8x96xf32> to vector<8x32xf32>
    %194 = vector.extract_strided_slice %184 {offsets = [0, 32], sizes = [8, 32], strides = [1, 1]} : vector<8x96xf32> to vector<8x32xf32>
    %195 = arith.addf %193, %194 : vector<8x32xf32>
    %196 = arith.negf %195 : vector<8x32xf32>
    %197 = math.exp %196 : vector<8x32xf32>
    %cst_86 = arith.constant 1.000000e+00 : f32
    %198 = vector.broadcast %cst_86 : f32 to vector<8x32xf32>
    %199 = arith.addf %198, %197 : vector<8x32xf32>
    %200 = arith.divf %198, %199 : vector<8x32xf32>
    %201 = vector.extract_strided_slice %177 {offsets = [0, 64], sizes = [8, 32], strides = [1, 1]} : vector<8x96xf32> to vector<8x32xf32>
    %202 = vector.extract_strided_slice %184 {offsets = [0, 64], sizes = [8, 32], strides = [1, 1]} : vector<8x96xf32> to vector<8x32xf32>
    %203 = arith.mulf %192, %202 : vector<8x32xf32>
    %204 = arith.addf %201, %203 : vector<8x32xf32>
    %205 = math.tanh %204 : vector<8x32xf32>
    %cst_87 = arith.constant 1.000000e+00 : f32
    %206 = vector.broadcast %cst_87 : f32 to vector<8x32xf32>
    %207 = arith.subf %206, %200 : vector<8x32xf32>
    %208 = arith.mulf %207, %205 : vector<8x32xf32>
    %209 = arith.mulf %200, %170 : vector<8x32xf32>
    %210 = arith.addf %208, %209 : vector<8x32xf32>
    %211 = arith.index_cast %c4_i32 : i32 to index
    %c0_88 = arith.constant 0 : index
    %c0_89 = arith.constant 0 : index
    %212 = vector.load %arg10[%211, %c0_88, %c0_89] : memref<8x8x32xf32, #tpu.memory_space<vmem>>, vector<1x8x32xf32>
    %213 = vector.shape_cast %212 : vector<1x8x32xf32> to vector<8x32xf32>
    %214 = vector.shape_cast %210 : vector<8x32xf32> to vector<1x8x32xf32>
    tpu.vector_store %arg10[%211, %c0_88, %c0_89], %214 {strides = array<i32>} : memref<8x8x32xf32, #tpu.memory_space<vmem>>, vector<1x8x32xf32>,
    %c5_i32 = arith.constant 5 : i32
    %215 = arith.index_cast %c5_i32 : i32 to index
    %c0_90 = arith.constant 0 : index
    %c0_91 = arith.constant 0 : index
    %216 = vector.load %arg11[%215, %c0_90, %c0_91] : memref<8x8x96xf32, #tpu.memory_space<vmem>>, vector<1x8x96xf32>
    %217 = vector.shape_cast %216 : vector<1x8x96xf32> to vector<8x96xf32>
    %c0_92 = arith.constant 0 : index
    %c0_93 = arith.constant 0 : index
    %c0_94 = arith.constant 0 : index
    %218 = vector.load %arg3[%c0_92, %c0_93, %c0_94] : memref<2x32x96xf32, #tpu.memory_space<vmem>>, vector<1x32x96xf32>
    %219 = vector.shape_cast %218 : vector<1x32x96xf32> to vector<32x96xf32>
    %cst_95 = arith.constant dense<0.000000e+00> : vector<8x96xf32>
    %220 = tpu.matmul %210, %219, %cst_95 {dimension_numbers = #tpu.dot_dimension_numbers<[1], [0], [0], [1], [0, 0, 1, 1], [], []>} : vector<8x32xf32>, vector<32x96xf32>, vector<8x96xf32> -> vector<8x96xf32>
    %c0_96 = arith.constant 0 : index
    %c0_97 = arith.constant 0 : index
    %c0_98 = arith.constant 0 : index
    %221 = vector.load %arg5[%c0_96, %c0_97, %c0_98] : memref<2x1x96xf32, #tpu.memory_space<vmem>>, vector<1x1x96xf32>
    %222 = vector.shape_cast %221 : vector<1x1x96xf32> to vector<1x96xf32>
    %223 = vector.broadcast %222 : vector<1x96xf32> to vector<8x96xf32>
    %224 = arith.addf %220, %223 : vector<8x96xf32>
    %225 = vector.extract_strided_slice %217 {offsets = [0, 0], sizes = [8, 32], strides = [1, 1]} : vector<8x96xf32> to vector<8x32xf32>
    %226 = vector.extract_strided_slice %224 {offsets = [0, 0], sizes = [8, 32], strides = [1, 1]} : vector<8x96xf32> to vector<8x32xf32>
    %227 = arith.addf %225, %226 : vector<8x32xf32>
    %228 = arith.negf %227 : vector<8x32xf32>
    %229 = math.exp %228 : vector<8x32xf32>
    %cst_99 = arith.constant 1.000000e+00 : f32
    %230 = vector.broadcast %cst_99 : f32 to vector<8x32xf32>
    %231 = arith.addf %230, %229 : vector<8x32xf32>
    %232 = arith.divf %230, %231 : vector<8x32xf32>
    %233 = vector.extract_strided_slice %217 {offsets = [0, 32], sizes = [8, 32], strides = [1, 1]} : vector<8x96xf32> to vector<8x32xf32>
    %234 = vector.extract_strided_slice %224 {offsets = [0, 32], sizes = [8, 32], strides = [1, 1]} : vector<8x96xf32> to vector<8x32xf32>
    %235 = arith.addf %233, %234 : vector<8x32xf32>
    %236 = arith.negf %235 : vector<8x32xf32>
    %237 = math.exp %236 : vector<8x32xf32>
    %cst_100 = arith.constant 1.000000e+00 : f32
    %238 = vector.broadcast %cst_100 : f32 to vector<8x32xf32>
    %239 = arith.addf %238, %237 : vector<8x32xf32>
    %240 = arith.divf %238, %239 : vector<8x32xf32>
    %241 = vector.extract_strided_slice %217 {offsets = [0, 64], sizes = [8, 32], strides = [1, 1]} : vector<8x96xf32> to vector<8x32xf32>
    %242 = vector.extract_strided_slice %224 {offsets = [0, 64], sizes = [8, 32], strides = [1, 1]} : vector<8x96xf32> to vector<8x32xf32>
    %243 = arith.mulf %232, %242 : vector<8x32xf32>
    %244 = arith.addf %241, %243 : vector<8x32xf32>
    %245 = math.tanh %244 : vector<8x32xf32>
    %cst_101 = arith.constant 1.000000e+00 : f32
    %246 = vector.broadcast %cst_101 : f32 to vector<8x32xf32>
    %247 = arith.subf %246, %240 : vector<8x32xf32>
    %248 = arith.mulf %247, %245 : vector<8x32xf32>
    %249 = arith.mulf %240, %210 : vector<8x32xf32>
    %250 = arith.addf %248, %249 : vector<8x32xf32>
    %251 = arith.index_cast %c5_i32 : i32 to index
    %c0_102 = arith.constant 0 : index
    %c0_103 = arith.constant 0 : index
    %252 = vector.load %arg10[%251, %c0_102, %c0_103] : memref<8x8x32xf32, #tpu.memory_space<vmem>>, vector<1x8x32xf32>
    %253 = vector.shape_cast %252 : vector<1x8x32xf32> to vector<8x32xf32>
    %254 = vector.shape_cast %250 : vector<8x32xf32> to vector<1x8x32xf32>
    tpu.vector_store %arg10[%251, %c0_102, %c0_103], %254 {strides = array<i32>} : memref<8x8x32xf32, #tpu.memory_space<vmem>>, vector<1x8x32xf32>,
    %c6_i32 = arith.constant 6 : i32
    %255 = arith.index_cast %c6_i32 : i32 to index
    %c0_104 = arith.constant 0 : index
    %c0_105 = arith.constant 0 : index
    %256 = vector.load %arg11[%255, %c0_104, %c0_105] : memref<8x8x96xf32, #tpu.memory_space<vmem>>, vector<1x8x96xf32>
    %257 = vector.shape_cast %256 : vector<1x8x96xf32> to vector<8x96xf32>
    %c0_106 = arith.constant 0 : index
    %c0_107 = arith.constant 0 : index
    %c0_108 = arith.constant 0 : index
    %258 = vector.load %arg3[%c0_106, %c0_107, %c0_108] : memref<2x32x96xf32, #tpu.memory_space<vmem>>, vector<1x32x96xf32>
    %259 = vector.shape_cast %258 : vector<1x32x96xf32> to vector<32x96xf32>
    %cst_109 = arith.constant dense<0.000000e+00> : vector<8x96xf32>
    %260 = tpu.matmul %250, %259, %cst_109 {dimension_numbers = #tpu.dot_dimension_numbers<[1], [0], [0], [1], [0, 0, 1, 1], [], []>} : vector<8x32xf32>, vector<32x96xf32>, vector<8x96xf32> -> vector<8x96xf32>
    %c0_110 = arith.constant 0 : index
    %c0_111 = arith.constant 0 : index
    %c0_112 = arith.constant 0 : index
    %261 = vector.load %arg5[%c0_110, %c0_111, %c0_112] : memref<2x1x96xf32, #tpu.memory_space<vmem>>, vector<1x1x96xf32>
    %262 = vector.shape_cast %261 : vector<1x1x96xf32> to vector<1x96xf32>
    %263 = vector.broadcast %262 : vector<1x96xf32> to vector<8x96xf32>
    %264 = arith.addf %260, %263 : vector<8x96xf32>
    %265 = vector.extract_strided_slice %257 {offsets = [0, 0], sizes = [8, 32], strides = [1, 1]} : vector<8x96xf32> to vector<8x32xf32>
    %266 = vector.extract_strided_slice %264 {offsets = [0, 0], sizes = [8, 32], strides = [1, 1]} : vector<8x96xf32> to vector<8x32xf32>
    %267 = arith.addf %265, %266 : vector<8x32xf32>
    %268 = arith.negf %267 : vector<8x32xf32>
    %269 = math.exp %268 : vector<8x32xf32>
    %cst_113 = arith.constant 1.000000e+00 : f32
    %270 = vector.broadcast %cst_113 : f32 to vector<8x32xf32>
    %271 = arith.addf %270, %269 : vector<8x32xf32>
    %272 = arith.divf %270, %271 : vector<8x32xf32>
    %273 = vector.extract_strided_slice %257 {offsets = [0, 32], sizes = [8, 32], strides = [1, 1]} : vector<8x96xf32> to vector<8x32xf32>
    %274 = vector.extract_strided_slice %264 {offsets = [0, 32], sizes = [8, 32], strides = [1, 1]} : vector<8x96xf32> to vector<8x32xf32>
    %275 = arith.addf %273, %274 : vector<8x32xf32>
    %276 = arith.negf %275 : vector<8x32xf32>
    %277 = math.exp %276 : vector<8x32xf32>
    %cst_114 = arith.constant 1.000000e+00 : f32
    %278 = vector.broadcast %cst_114 : f32 to vector<8x32xf32>
    %279 = arith.addf %278, %277 : vector<8x32xf32>
    %280 = arith.divf %278, %279 : vector<8x32xf32>
    %281 = vector.extract_strided_slice %257 {offsets = [0, 64], sizes = [8, 32], strides = [1, 1]} : vector<8x96xf32> to vector<8x32xf32>
    %282 = vector.extract_strided_slice %264 {offsets = [0, 64], sizes = [8, 32], strides = [1, 1]} : vector<8x96xf32> to vector<8x32xf32>
    %283 = arith.mulf %272, %282 : vector<8x32xf32>
    %284 = arith.addf %281, %283 : vector<8x32xf32>
    %285 = math.tanh %284 : vector<8x32xf32>
    %cst_115 = arith.constant 1.000000e+00 : f32
    %286 = vector.broadcast %cst_115 : f32 to vector<8x32xf32>
    %287 = arith.subf %286, %280 : vector<8x32xf32>
    %288 = arith.mulf %287, %285 : vector<8x32xf32>
    %289 = arith.mulf %280, %250 : vector<8x32xf32>
    %290 = arith.addf %288, %289 : vector<8x32xf32>
    %291 = arith.index_cast %c6_i32 : i32 to index
    %c0_116 = arith.constant 0 : index
    %c0_117 = arith.constant 0 : index
    %292 = vector.load %arg10[%291, %c0_116, %c0_117] : memref<8x8x32xf32, #tpu.memory_space<vmem>>, vector<1x8x32xf32>
    %293 = vector.shape_cast %292 : vector<1x8x32xf32> to vector<8x32xf32>
    %294 = vector.shape_cast %290 : vector<8x32xf32> to vector<1x8x32xf32>
    tpu.vector_store %arg10[%291, %c0_116, %c0_117], %294 {strides = array<i32>} : memref<8x8x32xf32, #tpu.memory_space<vmem>>, vector<1x8x32xf32>,
    %c7_i32 = arith.constant 7 : i32
    %295 = arith.index_cast %c7_i32 : i32 to index
    %c0_118 = arith.constant 0 : index
    %c0_119 = arith.constant 0 : index
    %296 = vector.load %arg11[%295, %c0_118, %c0_119] : memref<8x8x96xf32, #tpu.memory_space<vmem>>, vector<1x8x96xf32>
    %297 = vector.shape_cast %296 : vector<1x8x96xf32> to vector<8x96xf32>
    %c0_120 = arith.constant 0 : index
    %c0_121 = arith.constant 0 : index
    %c0_122 = arith.constant 0 : index
    %298 = vector.load %arg3[%c0_120, %c0_121, %c0_122] : memref<2x32x96xf32, #tpu.memory_space<vmem>>, vector<1x32x96xf32>
    %299 = vector.shape_cast %298 : vector<1x32x96xf32> to vector<32x96xf32>
    %cst_123 = arith.constant dense<0.000000e+00> : vector<8x96xf32>
    %300 = tpu.matmul %290, %299, %cst_123 {dimension_numbers = #tpu.dot_dimension_numbers<[1], [0], [0], [1], [0, 0, 1, 1], [], []>} : vector<8x32xf32>, vector<32x96xf32>, vector<8x96xf32> -> vector<8x96xf32>
    %c0_124 = arith.constant 0 : index
    %c0_125 = arith.constant 0 : index
    %c0_126 = arith.constant 0 : index
    %301 = vector.load %arg5[%c0_124, %c0_125, %c0_126] : memref<2x1x96xf32, #tpu.memory_space<vmem>>, vector<1x1x96xf32>
    %302 = vector.shape_cast %301 : vector<1x1x96xf32> to vector<1x96xf32>
    %303 = vector.broadcast %302 : vector<1x96xf32> to vector<8x96xf32>
    %304 = arith.addf %300, %303 : vector<8x96xf32>
    %305 = vector.extract_strided_slice %297 {offsets = [0, 0], sizes = [8, 32], strides = [1, 1]} : vector<8x96xf32> to vector<8x32xf32>
    %306 = vector.extract_strided_slice %304 {offsets = [0, 0], sizes = [8, 32], strides = [1, 1]} : vector<8x96xf32> to vector<8x32xf32>
    %307 = arith.addf %305, %306 : vector<8x32xf32>
    %308 = arith.negf %307 : vector<8x32xf32>
    %309 = math.exp %308 : vector<8x32xf32>
    %cst_127 = arith.constant 1.000000e+00 : f32
    %310 = vector.broadcast %cst_127 : f32 to vector<8x32xf32>
    %311 = arith.addf %310, %309 : vector<8x32xf32>
    %312 = arith.divf %310, %311 : vector<8x32xf32>
    %313 = vector.extract_strided_slice %297 {offsets = [0, 32], sizes = [8, 32], strides = [1, 1]} : vector<8x96xf32> to vector<8x32xf32>
    %314 = vector.extract_strided_slice %304 {offsets = [0, 32], sizes = [8, 32], strides = [1, 1]} : vector<8x96xf32> to vector<8x32xf32>
    %315 = arith.addf %313, %314 : vector<8x32xf32>
    %316 = arith.negf %315 : vector<8x32xf32>
    %317 = math.exp %316 : vector<8x32xf32>
    %cst_128 = arith.constant 1.000000e+00 : f32
    %318 = vector.broadcast %cst_128 : f32 to vector<8x32xf32>
    %319 = arith.addf %318, %317 : vector<8x32xf32>
    %320 = arith.divf %318, %319 : vector<8x32xf32>
    %321 = vector.extract_strided_slice %297 {offsets = [0, 64], sizes = [8, 32], strides = [1, 1]} : vector<8x96xf32> to vector<8x32xf32>
    %322 = vector.extract_strided_slice %304 {offsets = [0, 64], sizes = [8, 32], strides = [1, 1]} : vector<8x96xf32> to vector<8x32xf32>
    %323 = arith.mulf %312, %322 : vector<8x32xf32>
    %324 = arith.addf %321, %323 : vector<8x32xf32>
    %325 = math.tanh %324 : vector<8x32xf32>
    %cst_129 = arith.constant 1.000000e+00 : f32
    %326 = vector.broadcast %cst_129 : f32 to vector<8x32xf32>
    %327 = arith.subf %326, %320 : vector<8x32xf32>
    %328 = arith.mulf %327, %325 : vector<8x32xf32>
    %329 = arith.mulf %320, %290 : vector<8x32xf32>
    %330 = arith.addf %328, %329 : vector<8x32xf32>
    %331 = arith.index_cast %c7_i32 : i32 to index
    %c0_130 = arith.constant 0 : index
    %c0_131 = arith.constant 0 : index
    %332 = vector.load %arg10[%331, %c0_130, %c0_131] : memref<8x8x32xf32, #tpu.memory_space<vmem>>, vector<1x8x32xf32>
    %333 = vector.shape_cast %332 : vector<1x8x32xf32> to vector<8x32xf32>
    %334 = vector.shape_cast %330 : vector<8x32xf32> to vector<1x8x32xf32>
    tpu.vector_store %arg10[%331, %c0_130, %c0_131], %334 {strides = array<i32>} : memref<8x8x32xf32, #tpu.memory_space<vmem>>, vector<1x8x32xf32>,
    %c8_i32 = arith.constant 8 : i32
    %c0_132 = arith.constant 0 : index
    %c0_133 = arith.constant 0 : index
    %c0_134 = arith.constant 0 : index
    %335 = vector.load %arg9[%c0_132, %c0_133, %c0_134] : memref<2x8x32xf32, #tpu.memory_space<vmem>>, vector<1x8x32xf32>
    %336 = vector.shape_cast %335 : vector<1x8x32xf32> to vector<8x32xf32>
    %337 = vector.shape_cast %330 : vector<8x32xf32> to vector<1x8x32xf32>
    tpu.vector_store %arg9[%c0_132, %c0_133, %c0_134], %337 {strides = array<i32>} : memref<2x8x32xf32, #tpu.memory_space<vmem>>, vector<1x8x32xf32>,
    %c0_135 = arith.constant 0 : index
    %c0_136 = arith.constant 0 : index
    %c0_137 = arith.constant 0 : index
    %338 = vector.load %arg10[%c0_135, %c0_136, %c0_137] : memref<8x8x32xf32, #tpu.memory_space<vmem>>, vector<8x8x32xf32>
    %339 = vector.shape_cast %338 : vector<8x8x32xf32> to vector<64x32xf32>
    %c1 = arith.constant 1 : index
    %c0_138 = arith.constant 0 : index
    %c0_139 = arith.constant 0 : index
    %340 = vector.load %arg2[%c1, %c0_138, %c0_139] : memref<2x32x96xf32, #tpu.memory_space<vmem>>, vector<1x32x96xf32>
    %341 = vector.shape_cast %340 : vector<1x32x96xf32> to vector<32x96xf32>
    %cst_140 = arith.constant dense<0.000000e+00> : vector<64x96xf32>
    %342 = tpu.matmul %339, %341, %cst_140 {dimension_numbers = #tpu.dot_dimension_numbers<[1], [0], [0], [1], [0, 0, 1, 1], [], []>} : vector<64x32xf32>, vector<32x96xf32>, vector<64x96xf32> -> vector<64x96xf32>
    %c1_141 = arith.constant 1 : index
    %c0_142 = arith.constant 0 : index
    %c0_143 = arith.constant 0 : index
    %343 = vector.load %arg4[%c1_141, %c0_142, %c0_143] : memref<2x1x96xf32, #tpu.memory_space<vmem>>, vector<1x1x96xf32>
    %344 = vector.shape_cast %343 : vector<1x1x96xf32> to vector<1x96xf32>
    %345 = vector.broadcast %344 : vector<1x96xf32> to vector<64x96xf32>
    %346 = arith.addf %342, %345 : vector<64x96xf32>
    %347 = vector.shape_cast %346 : vector<64x96xf32> to vector<8x8x96xf32>
    %c0_144 = arith.constant 0 : index
    %c0_145 = arith.constant 0 : index
    %c0_146 = arith.constant 0 : index
    %348 = vector.load %arg11[%c0_144, %c0_145, %c0_146] : memref<8x8x96xf32, #tpu.memory_space<vmem>>, vector<8x8x96xf32>
    tpu.vector_store %arg11[%c0_144, %c0_145, %c0_146], %347 {strides = array<i32>} : memref<8x8x96xf32, #tpu.memory_space<vmem>>, vector<8x8x96xf32>,
    %c1_147 = arith.constant 1 : index
    %c0_148 = arith.constant 0 : index
    %c0_149 = arith.constant 0 : index
    %349 = vector.load %arg1[%c1_147, %c0_148, %c0_149] : memref<2x8x32xf32, #tpu.memory_space<vmem>>, vector<1x8x32xf32>
    %350 = vector.shape_cast %349 : vector<1x8x32xf32> to vector<8x32xf32>
    %c0_i32_150 = arith.constant 0 : i32
    %351 = arith.index_cast %c0_i32_150 : i32 to index
    %c0_151 = arith.constant 0 : index
    %c0_152 = arith.constant 0 : index
    %352 = vector.load %arg11[%351, %c0_151, %c0_152] : memref<8x8x96xf32, #tpu.memory_space<vmem>>, vector<1x8x96xf32>
    %353 = vector.shape_cast %352 : vector<1x8x96xf32> to vector<8x96xf32>
    %c1_153 = arith.constant 1 : index
    %c0_154 = arith.constant 0 : index
    %c0_155 = arith.constant 0 : index
    %354 = vector.load %arg3[%c1_153, %c0_154, %c0_155] : memref<2x32x96xf32, #tpu.memory_space<vmem>>, vector<1x32x96xf32>
    %355 = vector.shape_cast %354 : vector<1x32x96xf32> to vector<32x96xf32>
    %cst_156 = arith.constant dense<0.000000e+00> : vector<8x96xf32>
    %356 = tpu.matmul %350, %355, %cst_156 {dimension_numbers = #tpu.dot_dimension_numbers<[1], [0], [0], [1], [0, 0, 1, 1], [], []>} : vector<8x32xf32>, vector<32x96xf32>, vector<8x96xf32> -> vector<8x96xf32>
    %c1_157 = arith.constant 1 : index
    %c0_158 = arith.constant 0 : index
    %c0_159 = arith.constant 0 : index
    %357 = vector.load %arg5[%c1_157, %c0_158, %c0_159] : memref<2x1x96xf32, #tpu.memory_space<vmem>>, vector<1x1x96xf32>
    %358 = vector.shape_cast %357 : vector<1x1x96xf32> to vector<1x96xf32>
    %359 = vector.broadcast %358 : vector<1x96xf32> to vector<8x96xf32>
    %360 = arith.addf %356, %359 : vector<8x96xf32>
    %361 = vector.extract_strided_slice %353 {offsets = [0, 0], sizes = [8, 32], strides = [1, 1]} : vector<8x96xf32> to vector<8x32xf32>
    %362 = vector.extract_strided_slice %360 {offsets = [0, 0], sizes = [8, 32], strides = [1, 1]} : vector<8x96xf32> to vector<8x32xf32>
    %363 = arith.addf %361, %362 : vector<8x32xf32>
    %364 = arith.negf %363 : vector<8x32xf32>
    %365 = math.exp %364 : vector<8x32xf32>
    %cst_160 = arith.constant 1.000000e+00 : f32
    %366 = vector.broadcast %cst_160 : f32 to vector<8x32xf32>
    %367 = arith.addf %366, %365 : vector<8x32xf32>
    %368 = arith.divf %366, %367 : vector<8x32xf32>
    %369 = vector.extract_strided_slice %353 {offsets = [0, 32], sizes = [8, 32], strides = [1, 1]} : vector<8x96xf32> to vector<8x32xf32>
    %370 = vector.extract_strided_slice %360 {offsets = [0, 32], sizes = [8, 32], strides = [1, 1]} : vector<8x96xf32> to vector<8x32xf32>
    %371 = arith.addf %369, %370 : vector<8x32xf32>
    %372 = arith.negf %371 : vector<8x32xf32>
    %373 = math.exp %372 : vector<8x32xf32>
    %cst_161 = arith.constant 1.000000e+00 : f32
    %374 = vector.broadcast %cst_161 : f32 to vector<8x32xf32>
    %375 = arith.addf %374, %373 : vector<8x32xf32>
    %376 = arith.divf %374, %375 : vector<8x32xf32>
    %377 = vector.extract_strided_slice %353 {offsets = [0, 64], sizes = [8, 32], strides = [1, 1]} : vector<8x96xf32> to vector<8x32xf32>
    %378 = vector.extract_strided_slice %360 {offsets = [0, 64], sizes = [8, 32], strides = [1, 1]} : vector<8x96xf32> to vector<8x32xf32>
    %379 = arith.mulf %368, %378 : vector<8x32xf32>
    %380 = arith.addf %377, %379 : vector<8x32xf32>
    %381 = math.tanh %380 : vector<8x32xf32>
    %cst_162 = arith.constant 1.000000e+00 : f32
    %382 = vector.broadcast %cst_162 : f32 to vector<8x32xf32>
    %383 = arith.subf %382, %376 : vector<8x32xf32>
    %384 = arith.mulf %383, %381 : vector<8x32xf32>
    %385 = arith.mulf %376, %350 : vector<8x32xf32>
    %386 = arith.addf %384, %385 : vector<8x32xf32>
    %c1_i32_163 = arith.constant 1 : i32
    %387 = arith.index_cast %c1_i32_163 : i32 to index
    %c0_164 = arith.constant 0 : index
    %c0_165 = arith.constant 0 : index
    %388 = vector.load %arg11[%387, %c0_164, %c0_165] : memref<8x8x96xf32, #tpu.memory_space<vmem>>, vector<1x8x96xf32>
    %389 = vector.shape_cast %388 : vector<1x8x96xf32> to vector<8x96xf32>
    %c1_166 = arith.constant 1 : index
    %c0_167 = arith.constant 0 : index
    %c0_168 = arith.constant 0 : index
    %390 = vector.load %arg3[%c1_166, %c0_167, %c0_168] : memref<2x32x96xf32, #tpu.memory_space<vmem>>, vector<1x32x96xf32>
    %391 = vector.shape_cast %390 : vector<1x32x96xf32> to vector<32x96xf32>
    %cst_169 = arith.constant dense<0.000000e+00> : vector<8x96xf32>
    %392 = tpu.matmul %386, %391, %cst_169 {dimension_numbers = #tpu.dot_dimension_numbers<[1], [0], [0], [1], [0, 0, 1, 1], [], []>} : vector<8x32xf32>, vector<32x96xf32>, vector<8x96xf32> -> vector<8x96xf32>
    %c1_170 = arith.constant 1 : index
    %c0_171 = arith.constant 0 : index
    %c0_172 = arith.constant 0 : index
    %393 = vector.load %arg5[%c1_170, %c0_171, %c0_172] : memref<2x1x96xf32, #tpu.memory_space<vmem>>, vector<1x1x96xf32>
    %394 = vector.shape_cast %393 : vector<1x1x96xf32> to vector<1x96xf32>
    %395 = vector.broadcast %394 : vector<1x96xf32> to vector<8x96xf32>
    %396 = arith.addf %392, %395 : vector<8x96xf32>
    %397 = vector.extract_strided_slice %389 {offsets = [0, 0], sizes = [8, 32], strides = [1, 1]} : vector<8x96xf32> to vector<8x32xf32>
    %398 = vector.extract_strided_slice %396 {offsets = [0, 0], sizes = [8, 32], strides = [1, 1]} : vector<8x96xf32> to vector<8x32xf32>
    %399 = arith.addf %397, %398 : vector<8x32xf32>
    %400 = arith.negf %399 : vector<8x32xf32>
    %401 = math.exp %400 : vector<8x32xf32>
    %cst_173 = arith.constant 1.000000e+00 : f32
    %402 = vector.broadcast %cst_173 : f32 to vector<8x32xf32>
    %403 = arith.addf %402, %401 : vector<8x32xf32>
    %404 = arith.divf %402, %403 : vector<8x32xf32>
    %405 = vector.extract_strided_slice %389 {offsets = [0, 32], sizes = [8, 32], strides = [1, 1]} : vector<8x96xf32> to vector<8x32xf32>
    %406 = vector.extract_strided_slice %396 {offsets = [0, 32], sizes = [8, 32], strides = [1, 1]} : vector<8x96xf32> to vector<8x32xf32>
    %407 = arith.addf %405, %406 : vector<8x32xf32>
    %408 = arith.negf %407 : vector<8x32xf32>
    %409 = math.exp %408 : vector<8x32xf32>
    %cst_174 = arith.constant 1.000000e+00 : f32
    %410 = vector.broadcast %cst_174 : f32 to vector<8x32xf32>
    %411 = arith.addf %410, %409 : vector<8x32xf32>
    %412 = arith.divf %410, %411 : vector<8x32xf32>
    %413 = vector.extract_strided_slice %389 {offsets = [0, 64], sizes = [8, 32], strides = [1, 1]} : vector<8x96xf32> to vector<8x32xf32>
    %414 = vector.extract_strided_slice %396 {offsets = [0, 64], sizes = [8, 32], strides = [1, 1]} : vector<8x96xf32> to vector<8x32xf32>
    %415 = arith.mulf %404, %414 : vector<8x32xf32>
    %416 = arith.addf %413, %415 : vector<8x32xf32>
    %417 = math.tanh %416 : vector<8x32xf32>
    %cst_175 = arith.constant 1.000000e+00 : f32
    %418 = vector.broadcast %cst_175 : f32 to vector<8x32xf32>
    %419 = arith.subf %418, %412 : vector<8x32xf32>
    %420 = arith.mulf %419, %417 : vector<8x32xf32>
    %421 = arith.mulf %412, %386 : vector<8x32xf32>
    %422 = arith.addf %420, %421 : vector<8x32xf32>
    %c2_i32_176 = arith.constant 2 : i32
    %423 = arith.index_cast %c2_i32_176 : i32 to index
    %c0_177 = arith.constant 0 : index
    %c0_178 = arith.constant 0 : index
    %424 = vector.load %arg11[%423, %c0_177, %c0_178] : memref<8x8x96xf32, #tpu.memory_space<vmem>>, vector<1x8x96xf32>
    %425 = vector.shape_cast %424 : vector<1x8x96xf32> to vector<8x96xf32>
    %c1_179 = arith.constant 1 : index
    %c0_180 = arith.constant 0 : index
    %c0_181 = arith.constant 0 : index
    %426 = vector.load %arg3[%c1_179, %c0_180, %c0_181] : memref<2x32x96xf32, #tpu.memory_space<vmem>>, vector<1x32x96xf32>
    %427 = vector.shape_cast %426 : vector<1x32x96xf32> to vector<32x96xf32>
    %cst_182 = arith.constant dense<0.000000e+00> : vector<8x96xf32>
    %428 = tpu.matmul %422, %427, %cst_182 {dimension_numbers = #tpu.dot_dimension_numbers<[1], [0], [0], [1], [0, 0, 1, 1], [], []>} : vector<8x32xf32>, vector<32x96xf32>, vector<8x96xf32> -> vector<8x96xf32>
    %c1_183 = arith.constant 1 : index
    %c0_184 = arith.constant 0 : index
    %c0_185 = arith.constant 0 : index
    %429 = vector.load %arg5[%c1_183, %c0_184, %c0_185] : memref<2x1x96xf32, #tpu.memory_space<vmem>>, vector<1x1x96xf32>
    %430 = vector.shape_cast %429 : vector<1x1x96xf32> to vector<1x96xf32>
    %431 = vector.broadcast %430 : vector<1x96xf32> to vector<8x96xf32>
    %432 = arith.addf %428, %431 : vector<8x96xf32>
    %433 = vector.extract_strided_slice %425 {offsets = [0, 0], sizes = [8, 32], strides = [1, 1]} : vector<8x96xf32> to vector<8x32xf32>
    %434 = vector.extract_strided_slice %432 {offsets = [0, 0], sizes = [8, 32], strides = [1, 1]} : vector<8x96xf32> to vector<8x32xf32>
    %435 = arith.addf %433, %434 : vector<8x32xf32>
    %436 = arith.negf %435 : vector<8x32xf32>
    %437 = math.exp %436 : vector<8x32xf32>
    %cst_186 = arith.constant 1.000000e+00 : f32
    %438 = vector.broadcast %cst_186 : f32 to vector<8x32xf32>
    %439 = arith.addf %438, %437 : vector<8x32xf32>
    %440 = arith.divf %438, %439 : vector<8x32xf32>
    %441 = vector.extract_strided_slice %425 {offsets = [0, 32], sizes = [8, 32], strides = [1, 1]} : vector<8x96xf32> to vector<8x32xf32>
    %442 = vector.extract_strided_slice %432 {offsets = [0, 32], sizes = [8, 32], strides = [1, 1]} : vector<8x96xf32> to vector<8x32xf32>
    %443 = arith.addf %441, %442 : vector<8x32xf32>
    %444 = arith.negf %443 : vector<8x32xf32>
    %445 = math.exp %444 : vector<8x32xf32>
    %cst_187 = arith.constant 1.000000e+00 : f32
    %446 = vector.broadcast %cst_187 : f32 to vector<8x32xf32>
    %447 = arith.addf %446, %445 : vector<8x32xf32>
    %448 = arith.divf %446, %447 : vector<8x32xf32>
    %449 = vector.extract_strided_slice %425 {offsets = [0, 64], sizes = [8, 32], strides = [1, 1]} : vector<8x96xf32> to vector<8x32xf32>
    %450 = vector.extract_strided_slice %432 {offsets = [0, 64], sizes = [8, 32], strides = [1, 1]} : vector<8x96xf32> to vector<8x32xf32>
    %451 = arith.mulf %440, %450 : vector<8x32xf32>
    %452 = arith.addf %449, %451 : vector<8x32xf32>
    %453 = math.tanh %452 : vector<8x32xf32>
    %cst_188 = arith.constant 1.000000e+00 : f32
    %454 = vector.broadcast %cst_188 : f32 to vector<8x32xf32>
    %455 = arith.subf %454, %448 : vector<8x32xf32>
    %456 = arith.mulf %455, %453 : vector<8x32xf32>
    %457 = arith.mulf %448, %422 : vector<8x32xf32>
    %458 = arith.addf %456, %457 : vector<8x32xf32>
    %c3_i32_189 = arith.constant 3 : i32
    %459 = arith.index_cast %c3_i32_189 : i32 to index
    %c0_190 = arith.constant 0 : index
    %c0_191 = arith.constant 0 : index
    %460 = vector.load %arg11[%459, %c0_190, %c0_191] : memref<8x8x96xf32, #tpu.memory_space<vmem>>, vector<1x8x96xf32>
    %461 = vector.shape_cast %460 : vector<1x8x96xf32> to vector<8x96xf32>
    %c1_192 = arith.constant 1 : index
    %c0_193 = arith.constant 0 : index
    %c0_194 = arith.constant 0 : index
    %462 = vector.load %arg3[%c1_192, %c0_193, %c0_194] : memref<2x32x96xf32, #tpu.memory_space<vmem>>, vector<1x32x96xf32>
    %463 = vector.shape_cast %462 : vector<1x32x96xf32> to vector<32x96xf32>
    %cst_195 = arith.constant dense<0.000000e+00> : vector<8x96xf32>
    %464 = tpu.matmul %458, %463, %cst_195 {dimension_numbers = #tpu.dot_dimension_numbers<[1], [0], [0], [1], [0, 0, 1, 1], [], []>} : vector<8x32xf32>, vector<32x96xf32>, vector<8x96xf32> -> vector<8x96xf32>
    %c1_196 = arith.constant 1 : index
    %c0_197 = arith.constant 0 : index
    %c0_198 = arith.constant 0 : index
    %465 = vector.load %arg5[%c1_196, %c0_197, %c0_198] : memref<2x1x96xf32, #tpu.memory_space<vmem>>, vector<1x1x96xf32>
    %466 = vector.shape_cast %465 : vector<1x1x96xf32> to vector<1x96xf32>
    %467 = vector.broadcast %466 : vector<1x96xf32> to vector<8x96xf32>
    %468 = arith.addf %464, %467 : vector<8x96xf32>
    %469 = vector.extract_strided_slice %461 {offsets = [0, 0], sizes = [8, 32], strides = [1, 1]} : vector<8x96xf32> to vector<8x32xf32>
    %470 = vector.extract_strided_slice %468 {offsets = [0, 0], sizes = [8, 32], strides = [1, 1]} : vector<8x96xf32> to vector<8x32xf32>
    %471 = arith.addf %469, %470 : vector<8x32xf32>
    %472 = arith.negf %471 : vector<8x32xf32>
    %473 = math.exp %472 : vector<8x32xf32>
    %cst_199 = arith.constant 1.000000e+00 : f32
    %474 = vector.broadcast %cst_199 : f32 to vector<8x32xf32>
    %475 = arith.addf %474, %473 : vector<8x32xf32>
    %476 = arith.divf %474, %475 : vector<8x32xf32>
    %477 = vector.extract_strided_slice %461 {offsets = [0, 32], sizes = [8, 32], strides = [1, 1]} : vector<8x96xf32> to vector<8x32xf32>
    %478 = vector.extract_strided_slice %468 {offsets = [0, 32], sizes = [8, 32], strides = [1, 1]} : vector<8x96xf32> to vector<8x32xf32>
    %479 = arith.addf %477, %478 : vector<8x32xf32>
    %480 = arith.negf %479 : vector<8x32xf32>
    %481 = math.exp %480 : vector<8x32xf32>
    %cst_200 = arith.constant 1.000000e+00 : f32
    %482 = vector.broadcast %cst_200 : f32 to vector<8x32xf32>
    %483 = arith.addf %482, %481 : vector<8x32xf32>
    %484 = arith.divf %482, %483 : vector<8x32xf32>
    %485 = vector.extract_strided_slice %461 {offsets = [0, 64], sizes = [8, 32], strides = [1, 1]} : vector<8x96xf32> to vector<8x32xf32>
    %486 = vector.extract_strided_slice %468 {offsets = [0, 64], sizes = [8, 32], strides = [1, 1]} : vector<8x96xf32> to vector<8x32xf32>
    %487 = arith.mulf %476, %486 : vector<8x32xf32>
    %488 = arith.addf %485, %487 : vector<8x32xf32>
    %489 = math.tanh %488 : vector<8x32xf32>
    %cst_201 = arith.constant 1.000000e+00 : f32
    %490 = vector.broadcast %cst_201 : f32 to vector<8x32xf32>
    %491 = arith.subf %490, %484 : vector<8x32xf32>
    %492 = arith.mulf %491, %489 : vector<8x32xf32>
    %493 = arith.mulf %484, %458 : vector<8x32xf32>
    %494 = arith.addf %492, %493 : vector<8x32xf32>
    %c4_i32_202 = arith.constant 4 : i32
    %495 = arith.index_cast %c4_i32_202 : i32 to index
    %c0_203 = arith.constant 0 : index
    %c0_204 = arith.constant 0 : index
    %496 = vector.load %arg11[%495, %c0_203, %c0_204] : memref<8x8x96xf32, #tpu.memory_space<vmem>>, vector<1x8x96xf32>
    %497 = vector.shape_cast %496 : vector<1x8x96xf32> to vector<8x96xf32>
    %c1_205 = arith.constant 1 : index
    %c0_206 = arith.constant 0 : index
    %c0_207 = arith.constant 0 : index
    %498 = vector.load %arg3[%c1_205, %c0_206, %c0_207] : memref<2x32x96xf32, #tpu.memory_space<vmem>>, vector<1x32x96xf32>
    %499 = vector.shape_cast %498 : vector<1x32x96xf32> to vector<32x96xf32>
    %cst_208 = arith.constant dense<0.000000e+00> : vector<8x96xf32>
    %500 = tpu.matmul %494, %499, %cst_208 {dimension_numbers = #tpu.dot_dimension_numbers<[1], [0], [0], [1], [0, 0, 1, 1], [], []>} : vector<8x32xf32>, vector<32x96xf32>, vector<8x96xf32> -> vector<8x96xf32>
    %c1_209 = arith.constant 1 : index
    %c0_210 = arith.constant 0 : index
    %c0_211 = arith.constant 0 : index
    %501 = vector.load %arg5[%c1_209, %c0_210, %c0_211] : memref<2x1x96xf32, #tpu.memory_space<vmem>>, vector<1x1x96xf32>
    %502 = vector.shape_cast %501 : vector<1x1x96xf32> to vector<1x96xf32>
    %503 = vector.broadcast %502 : vector<1x96xf32> to vector<8x96xf32>
    %504 = arith.addf %500, %503 : vector<8x96xf32>
    %505 = vector.extract_strided_slice %497 {offsets = [0, 0], sizes = [8, 32], strides = [1, 1]} : vector<8x96xf32> to vector<8x32xf32>
    %506 = vector.extract_strided_slice %504 {offsets = [0, 0], sizes = [8, 32], strides = [1, 1]} : vector<8x96xf32> to vector<8x32xf32>
    %507 = arith.addf %505, %506 : vector<8x32xf32>
    %508 = arith.negf %507 : vector<8x32xf32>
    %509 = math.exp %508 : vector<8x32xf32>
    %cst_212 = arith.constant 1.000000e+00 : f32
    %510 = vector.broadcast %cst_212 : f32 to vector<8x32xf32>
    %511 = arith.addf %510, %509 : vector<8x32xf32>
    %512 = arith.divf %510, %511 : vector<8x32xf32>
    %513 = vector.extract_strided_slice %497 {offsets = [0, 32], sizes = [8, 32], strides = [1, 1]} : vector<8x96xf32> to vector<8x32xf32>
    %514 = vector.extract_strided_slice %504 {offsets = [0, 32], sizes = [8, 32], strides = [1, 1]} : vector<8x96xf32> to vector<8x32xf32>
    %515 = arith.addf %513, %514 : vector<8x32xf32>
    %516 = arith.negf %515 : vector<8x32xf32>
    %517 = math.exp %516 : vector<8x32xf32>
    %cst_213 = arith.constant 1.000000e+00 : f32
    %518 = vector.broadcast %cst_213 : f32 to vector<8x32xf32>
    %519 = arith.addf %518, %517 : vector<8x32xf32>
    %520 = arith.divf %518, %519 : vector<8x32xf32>
    %521 = vector.extract_strided_slice %497 {offsets = [0, 64], sizes = [8, 32], strides = [1, 1]} : vector<8x96xf32> to vector<8x32xf32>
    %522 = vector.extract_strided_slice %504 {offsets = [0, 64], sizes = [8, 32], strides = [1, 1]} : vector<8x96xf32> to vector<8x32xf32>
    %523 = arith.mulf %512, %522 : vector<8x32xf32>
    %524 = arith.addf %521, %523 : vector<8x32xf32>
    %525 = math.tanh %524 : vector<8x32xf32>
    %cst_214 = arith.constant 1.000000e+00 : f32
    %526 = vector.broadcast %cst_214 : f32 to vector<8x32xf32>
    %527 = arith.subf %526, %520 : vector<8x32xf32>
    %528 = arith.mulf %527, %525 : vector<8x32xf32>
    %529 = arith.mulf %520, %494 : vector<8x32xf32>
    %530 = arith.addf %528, %529 : vector<8x32xf32>
    %c5_i32_215 = arith.constant 5 : i32
    %531 = arith.index_cast %c5_i32_215 : i32 to index
    %c0_216 = arith.constant 0 : index
    %c0_217 = arith.constant 0 : index
    %532 = vector.load %arg11[%531, %c0_216, %c0_217] : memref<8x8x96xf32, #tpu.memory_space<vmem>>, vector<1x8x96xf32>
    %533 = vector.shape_cast %532 : vector<1x8x96xf32> to vector<8x96xf32>
    %c1_218 = arith.constant 1 : index
    %c0_219 = arith.constant 0 : index
    %c0_220 = arith.constant 0 : index
    %534 = vector.load %arg3[%c1_218, %c0_219, %c0_220] : memref<2x32x96xf32, #tpu.memory_space<vmem>>, vector<1x32x96xf32>
    %535 = vector.shape_cast %534 : vector<1x32x96xf32> to vector<32x96xf32>
    %cst_221 = arith.constant dense<0.000000e+00> : vector<8x96xf32>
    %536 = tpu.matmul %530, %535, %cst_221 {dimension_numbers = #tpu.dot_dimension_numbers<[1], [0], [0], [1], [0, 0, 1, 1], [], []>} : vector<8x32xf32>, vector<32x96xf32>, vector<8x96xf32> -> vector<8x96xf32>
    %c1_222 = arith.constant 1 : index
    %c0_223 = arith.constant 0 : index
    %c0_224 = arith.constant 0 : index
    %537 = vector.load %arg5[%c1_222, %c0_223, %c0_224] : memref<2x1x96xf32, #tpu.memory_space<vmem>>, vector<1x1x96xf32>
    %538 = vector.shape_cast %537 : vector<1x1x96xf32> to vector<1x96xf32>
    %539 = vector.broadcast %538 : vector<1x96xf32> to vector<8x96xf32>
    %540 = arith.addf %536, %539 : vector<8x96xf32>
    %541 = vector.extract_strided_slice %533 {offsets = [0, 0], sizes = [8, 32], strides = [1, 1]} : vector<8x96xf32> to vector<8x32xf32>
    %542 = vector.extract_strided_slice %540 {offsets = [0, 0], sizes = [8, 32], strides = [1, 1]} : vector<8x96xf32> to vector<8x32xf32>
    %543 = arith.addf %541, %542 : vector<8x32xf32>
    %544 = arith.negf %543 : vector<8x32xf32>
    %545 = math.exp %544 : vector<8x32xf32>
    %cst_225 = arith.constant 1.000000e+00 : f32
    %546 = vector.broadcast %cst_225 : f32 to vector<8x32xf32>
    %547 = arith.addf %546, %545 : vector<8x32xf32>
    %548 = arith.divf %546, %547 : vector<8x32xf32>
    %549 = vector.extract_strided_slice %533 {offsets = [0, 32], sizes = [8, 32], strides = [1, 1]} : vector<8x96xf32> to vector<8x32xf32>
    %550 = vector.extract_strided_slice %540 {offsets = [0, 32], sizes = [8, 32], strides = [1, 1]} : vector<8x96xf32> to vector<8x32xf32>
    %551 = arith.addf %549, %550 : vector<8x32xf32>
    %552 = arith.negf %551 : vector<8x32xf32>
    %553 = math.exp %552 : vector<8x32xf32>
    %cst_226 = arith.constant 1.000000e+00 : f32
    %554 = vector.broadcast %cst_226 : f32 to vector<8x32xf32>
    %555 = arith.addf %554, %553 : vector<8x32xf32>
    %556 = arith.divf %554, %555 : vector<8x32xf32>
    %557 = vector.extract_strided_slice %533 {offsets = [0, 64], sizes = [8, 32], strides = [1, 1]} : vector<8x96xf32> to vector<8x32xf32>
    %558 = vector.extract_strided_slice %540 {offsets = [0, 64], sizes = [8, 32], strides = [1, 1]} : vector<8x96xf32> to vector<8x32xf32>
    %559 = arith.mulf %548, %558 : vector<8x32xf32>
    %560 = arith.addf %557, %559 : vector<8x32xf32>
    %561 = math.tanh %560 : vector<8x32xf32>
    %cst_227 = arith.constant 1.000000e+00 : f32
    %562 = vector.broadcast %cst_227 : f32 to vector<8x32xf32>
    %563 = arith.subf %562, %556 : vector<8x32xf32>
    %564 = arith.mulf %563, %561 : vector<8x32xf32>
    %565 = arith.mulf %556, %530 : vector<8x32xf32>
    %566 = arith.addf %564, %565 : vector<8x32xf32>
    %c6_i32_228 = arith.constant 6 : i32
    %567 = arith.index_cast %c6_i32_228 : i32 to index
    %c0_229 = arith.constant 0 : index
    %c0_230 = arith.constant 0 : index
    %568 = vector.load %arg11[%567, %c0_229, %c0_230] : memref<8x8x96xf32, #tpu.memory_space<vmem>>, vector<1x8x96xf32>
    %569 = vector.shape_cast %568 : vector<1x8x96xf32> to vector<8x96xf32>
    %c1_231 = arith.constant 1 : index
    %c0_232 = arith.constant 0 : index
    %c0_233 = arith.constant 0 : index
    %570 = vector.load %arg3[%c1_231, %c0_232, %c0_233] : memref<2x32x96xf32, #tpu.memory_space<vmem>>, vector<1x32x96xf32>
    %571 = vector.shape_cast %570 : vector<1x32x96xf32> to vector<32x96xf32>
    %cst_234 = arith.constant dense<0.000000e+00> : vector<8x96xf32>
    %572 = tpu.matmul %566, %571, %cst_234 {dimension_numbers = #tpu.dot_dimension_numbers<[1], [0], [0], [1], [0, 0, 1, 1], [], []>} : vector<8x32xf32>, vector<32x96xf32>, vector<8x96xf32> -> vector<8x96xf32>
    %c1_235 = arith.constant 1 : index
    %c0_236 = arith.constant 0 : index
    %c0_237 = arith.constant 0 : index
    %573 = vector.load %arg5[%c1_235, %c0_236, %c0_237] : memref<2x1x96xf32, #tpu.memory_space<vmem>>, vector<1x1x96xf32>
    %574 = vector.shape_cast %573 : vector<1x1x96xf32> to vector<1x96xf32>
    %575 = vector.broadcast %574 : vector<1x96xf32> to vector<8x96xf32>
    %576 = arith.addf %572, %575 : vector<8x96xf32>
    %577 = vector.extract_strided_slice %569 {offsets = [0, 0], sizes = [8, 32], strides = [1, 1]} : vector<8x96xf32> to vector<8x32xf32>
    %578 = vector.extract_strided_slice %576 {offsets = [0, 0], sizes = [8, 32], strides = [1, 1]} : vector<8x96xf32> to vector<8x32xf32>
    %579 = arith.addf %577, %578 : vector<8x32xf32>
    %580 = arith.negf %579 : vector<8x32xf32>
    %581 = math.exp %580 : vector<8x32xf32>
    %cst_238 = arith.constant 1.000000e+00 : f32
    %582 = vector.broadcast %cst_238 : f32 to vector<8x32xf32>
    %583 = arith.addf %582, %581 : vector<8x32xf32>
    %584 = arith.divf %582, %583 : vector<8x32xf32>
    %585 = vector.extract_strided_slice %569 {offsets = [0, 32], sizes = [8, 32], strides = [1, 1]} : vector<8x96xf32> to vector<8x32xf32>
    %586 = vector.extract_strided_slice %576 {offsets = [0, 32], sizes = [8, 32], strides = [1, 1]} : vector<8x96xf32> to vector<8x32xf32>
    %587 = arith.addf %585, %586 : vector<8x32xf32>
    %588 = arith.negf %587 : vector<8x32xf32>
    %589 = math.exp %588 : vector<8x32xf32>
    %cst_239 = arith.constant 1.000000e+00 : f32
    %590 = vector.broadcast %cst_239 : f32 to vector<8x32xf32>
    %591 = arith.addf %590, %589 : vector<8x32xf32>
    %592 = arith.divf %590, %591 : vector<8x32xf32>
    %593 = vector.extract_strided_slice %569 {offsets = [0, 64], sizes = [8, 32], strides = [1, 1]} : vector<8x96xf32> to vector<8x32xf32>
    %594 = vector.extract_strided_slice %576 {offsets = [0, 64], sizes = [8, 32], strides = [1, 1]} : vector<8x96xf32> to vector<8x32xf32>
    %595 = arith.mulf %584, %594 : vector<8x32xf32>
    %596 = arith.addf %593, %595 : vector<8x32xf32>
    %597 = math.tanh %596 : vector<8x32xf32>
    %cst_240 = arith.constant 1.000000e+00 : f32
    %598 = vector.broadcast %cst_240 : f32 to vector<8x32xf32>
    %599 = arith.subf %598, %592 : vector<8x32xf32>
    %600 = arith.mulf %599, %597 : vector<8x32xf32>
    %601 = arith.mulf %592, %566 : vector<8x32xf32>
    %602 = arith.addf %600, %601 : vector<8x32xf32>
    %c7_i32_241 = arith.constant 7 : i32
    %603 = arith.index_cast %c7_i32_241 : i32 to index
    %c0_242 = arith.constant 0 : index
    %c0_243 = arith.constant 0 : index
    %604 = vector.load %arg11[%603, %c0_242, %c0_243] : memref<8x8x96xf32, #tpu.memory_space<vmem>>, vector<1x8x96xf32>
    %605 = vector.shape_cast %604 : vector<1x8x96xf32> to vector<8x96xf32>
    %c1_244 = arith.constant 1 : index
    %c0_245 = arith.constant 0 : index
    %c0_246 = arith.constant 0 : index
    %606 = vector.load %arg3[%c1_244, %c0_245, %c0_246] : memref<2x32x96xf32, #tpu.memory_space<vmem>>, vector<1x32x96xf32>
    %607 = vector.shape_cast %606 : vector<1x32x96xf32> to vector<32x96xf32>
    %cst_247 = arith.constant dense<0.000000e+00> : vector<8x96xf32>
    %608 = tpu.matmul %602, %607, %cst_247 {dimension_numbers = #tpu.dot_dimension_numbers<[1], [0], [0], [1], [0, 0, 1, 1], [], []>} : vector<8x32xf32>, vector<32x96xf32>, vector<8x96xf32> -> vector<8x96xf32>
    %c1_248 = arith.constant 1 : index
    %c0_249 = arith.constant 0 : index
    %c0_250 = arith.constant 0 : index
    %609 = vector.load %arg5[%c1_248, %c0_249, %c0_250] : memref<2x1x96xf32, #tpu.memory_space<vmem>>, vector<1x1x96xf32>
    %610 = vector.shape_cast %609 : vector<1x1x96xf32> to vector<1x96xf32>
    %611 = vector.broadcast %610 : vector<1x96xf32> to vector<8x96xf32>
    %612 = arith.addf %608, %611 : vector<8x96xf32>
    %613 = vector.extract_strided_slice %605 {offsets = [0, 0], sizes = [8, 32], strides = [1, 1]} : vector<8x96xf32> to vector<8x32xf32>
    %614 = vector.extract_strided_slice %612 {offsets = [0, 0], sizes = [8, 32], strides = [1, 1]} : vector<8x96xf32> to vector<8x32xf32>
    %615 = arith.addf %613, %614 : vector<8x32xf32>
    %616 = arith.negf %615 : vector<8x32xf32>
    %617 = math.exp %616 : vector<8x32xf32>
    %cst_251 = arith.constant 1.000000e+00 : f32
    %618 = vector.broadcast %cst_251 : f32 to vector<8x32xf32>
    %619 = arith.addf %618, %617 : vector<8x32xf32>
    %620 = arith.divf %618, %619 : vector<8x32xf32>
    %621 = vector.extract_strided_slice %605 {offsets = [0, 32], sizes = [8, 32], strides = [1, 1]} : vector<8x96xf32> to vector<8x32xf32>
    %622 = vector.extract_strided_slice %612 {offsets = [0, 32], sizes = [8, 32], strides = [1, 1]} : vector<8x96xf32> to vector<8x32xf32>
    %623 = arith.addf %621, %622 : vector<8x32xf32>
    %624 = arith.negf %623 : vector<8x32xf32>
    %625 = math.exp %624 : vector<8x32xf32>
    %cst_252 = arith.constant 1.000000e+00 : f32
    %626 = vector.broadcast %cst_252 : f32 to vector<8x32xf32>
    %627 = arith.addf %626, %625 : vector<8x32xf32>
    %628 = arith.divf %626, %627 : vector<8x32xf32>
    %629 = vector.extract_strided_slice %605 {offsets = [0, 64], sizes = [8, 32], strides = [1, 1]} : vector<8x96xf32> to vector<8x32xf32>
    %630 = vector.extract_strided_slice %612 {offsets = [0, 64], sizes = [8, 32], strides = [1, 1]} : vector<8x96xf32> to vector<8x32xf32>
    %631 = arith.mulf %620, %630 : vector<8x32xf32>
    %632 = arith.addf %629, %631 : vector<8x32xf32>
    %633 = math.tanh %632 : vector<8x32xf32>
    %cst_253 = arith.constant 1.000000e+00 : f32
    %634 = vector.broadcast %cst_253 : f32 to vector<8x32xf32>
    %635 = arith.subf %634, %628 : vector<8x32xf32>
    %636 = arith.mulf %635, %633 : vector<8x32xf32>
    %637 = arith.mulf %628, %602 : vector<8x32xf32>
    %638 = arith.addf %636, %637 : vector<8x32xf32>
    %c8_i32_254 = arith.constant 8 : i32
    %c1_255 = arith.constant 1 : index
    %c0_256 = arith.constant 0 : index
    %c0_257 = arith.constant 0 : index
    %639 = vector.load %arg9[%c1_255, %c0_256, %c0_257] : memref<2x8x32xf32, #tpu.memory_space<vmem>>, vector<1x8x32xf32>
    %640 = vector.shape_cast %639 : vector<1x8x32xf32> to vector<8x32xf32>
    %641 = vector.shape_cast %638 : vector<8x32xf32> to vector<1x8x32xf32>
    tpu.vector_store %arg9[%c1_255, %c0_256, %c0_257], %641 {strides = array<i32>} : memref<2x8x32xf32, #tpu.memory_space<vmem>>, vector<1x8x32xf32>,
    %cst_258 = arith.constant 0.000000e+00 : f32
    %642 = vector.broadcast %cst_258 : f32 to vector<8x32xf32>
    %643 = arith.maximumf %638, %642 : vector<8x32xf32>
    %c0_259 = arith.constant 0 : index
    %c0_260 = arith.constant 0 : index
    %644 = vector.load %arg6[%c0_259, %c0_260] : memref<32x1xf32, #tpu.memory_space<vmem>>, vector<32x1xf32>
    %cst_261 = arith.constant dense<0.000000e+00> : vector<8x1xf32>
    %645 = tpu.matmul %643, %644, %cst_261 {dimension_numbers = #tpu.dot_dimension_numbers<[1], [0], [0], [1], [0, 0, 1, 1], [], []>} : vector<8x32xf32>, vector<32x1xf32>, vector<8x1xf32> -> vector<8x1xf32>
    %c0_262 = arith.constant 0 : index
    %c0_263 = arith.constant 0 : index
    %646 = vector.load %arg7[%c0_262, %c0_263] : memref<1x1xf32, #tpu.memory_space<vmem>>, vector<1x1xf32>
    %647 = vector.broadcast %646 : vector<1x1xf32> to vector<8x1xf32>
    %648 = arith.addf %645, %647 : vector<8x1xf32>
    %c0_264 = arith.constant 0 : index
    %c0_265 = arith.constant 0 : index
    %649 = vector.load %arg8[%c0_264, %c0_265] : memref<8x1xf32, #tpu.memory_space<vmem>>, vector<8x1xf32>
    tpu.vector_store %arg8[%c0_264, %c0_265], %648 {strides = array<i32>} : memref<8x1xf32, #tpu.memory_space<vmem>>, vector<8x1xf32>,
    return
  }
}

</mosaic_0001>

<bundles_post_ra>
// kernel: gru_net_forward.1
= control target key start
LH: loop header
LB: loop body
LE: loop exit
PB: predicated region body
PF: predicated region fallthrough
CT: control target
= control target key end

     0   :  { %s3320_s0 = inlined_call_operand.vmem [shape: f32[8,8,32], index: 0, kind: input, shape index: {}]   ;;  %s3321_s1 = inlined_call_operand.vmem [shape: f32[2,8,32], index: 1, kind: input, shape index: {}]   ;;  %s3322_s2 = inlined_call_operand.vmem [shape: f32[2,32,96], index: 2, kind: input, shape index: {}]   ;;  %s3323_s3 = inlined_call_operand.vmem [shape: f32[2,32,96], index: 3, kind: input, shape index: {}]   ;;  %s3324_s4 = inlined_call_operand.vmem [shape: f32[2,1,96], index: 4, kind: input, shape index: {}]   ;;  %s3325_s5 = inlined_call_operand.vmem [shape: f32[2,1,96], index: 5, kind: input, shape index: {}]   ;;  %s3326_s6 = inlined_call_operand.vmem [shape: f32[32,1], index: 6, kind: input, shape index: {}]   ;;  %s3327_s7 = inlined_call_operand.<no memory space> [shape: f32[1,1], index: 7, kind: input, shape index: {}]   ;;  %s3328_s8 = inlined_call_operand.vmem [shape: f32[8,1], index: 8, kind: output, shape index: {0}]   ;;  %s3329_s9 = inlined_call_operand.hbm [shape: f32[2,8,32], index: 9, kind: output, shape index: {1}]  }
   0x1   :  { %v15_v0 = vstv %s3327_s7 }
   0x2   :  { %16 = vst [vmem:[#allocation4] sm:$0x1] %v15_v0 }
   0x3   :  { %v62_v1 = vld [vmem:[%s3322_s2 + $0x18] sm:$0xff]  ;;  %v61_v3 = vld [vmem:[%s3322_s2 + $0x10] sm:$0xff]  ;;  %vm42_vm0 = vcmask 261120   ;;  %v2787_v4 = vmov 0.0   ;;  %v60_v6 = vld [vmem:[%s3322_s2 + $0x8] sm:$0xff] }
   0x4   :  { %v2854_v2 = vld [vmem:[%s3323_s3 + $0x18] sm:$0xff]  ;;  %2454 = vmatprep.subr.mxu1 %v2787_v4  ;;  %2434 = vmatprep.subr.mxu0 %v62_v1  ;;  %v2863_v5 = vld [vmem:[%s3323_s3 + $0x10] sm:$0xff]  ;;  %v34_v7 = vld [vmem:[%s3320_s0] sm:$0xff] }
   0x5   :  { %2455 = vmatpush3.msra.mxu1 %v2854_v2  ;;  %2435 = vmatpush3.msra.mxu0 %v62_v1  ;;  %v2876_v8 = vld [vmem:[%s3323_s3 + $0x8] sm:$0xff]  ;;  %43 = vst.msk [vmem:[#allocation2] sm:$0xff] %vm42_vm0, %v34_v7  ;;  %v59_v10 = vld [vmem:[%s3322_s2] sm:$0xff] }
   0x6   :  { %2456 = vmatprep.subr.mxu1 %v2787_v4  ;;  %2436 = vmatprep.subr.mxu0 %v61_v3  ;;  %v35_v9 = vld [vmem:[%s3320_s0 + $0x8] sm:$0xff] }
   0x7   :  { %2457 = vmatpush3.msra.mxu1 %v2863_v5  ;;  %2437 = vmatpush3.msra.mxu0 %v61_v3  ;;  %44 = vst.msk [vmem:[#allocation2 + $0x8] sm:$0xff] %vm42_vm0, %v35_v9 }
   0x8   :  { %17 = vsyncpa [#allocation6], 0  ;;  %2458 = vmatprep.subr.mxu1 %v2787_v4  ;;  %2438 = vmatprep.subr.mxu0 %v60_v6  ;;  %v2891_v11 = vld [vmem:[%s3323_s3] sm:$0xff]  ;;  %vm2788_vm1 = vmmov 0   ;;  %s2789_s15 = smov 64   ;;  %vm199_vm2 = vcmask 785408  }
   0x9   :  { %2459 = vmatpush3.msra.mxu1 %v2876_v8  ;;  %2439 = vmatpush3.msra.mxu0 %v60_v6  ;;  %v208_v12 = vld [vmem:[%s3321_s1] sm:$0xff]  ;;  %s2790_s16 = smov 96   ;;  %s2791_s7 = smov 32   ;;  %v36_v55 = vld [vmem:[%s3320_s0 + $0x10] sm:$0xff]  ;;  %v37_v56 = vld [vmem:[%s3320_s0 + $0x18] sm:$0xff] }
   0xa   :  { %2460 = vmatprep.subr.mxu1 %v2787_v4  ;;  %2440 = vmatprep.subr.mxu0 %v59_v10  ;;  %v2927_v15 = vld [vmem:[%s3325_s5] ss:$0 sm:$0xff]  ;;  %45 = vst.msk [vmem:[#allocation2 + $0x10] sm:$0xff] %vm42_vm0, %v36_v55  ;;  %46 = vst.msk [vmem:[#allocation2 + $0x18] sm:$0xff] %vm42_vm0, %v37_v56  ;;  %v39_v58 = vld [vmem:[%s3320_s0 + $0x28] sm:$0xff]  ;;  %s2792_s10 = smov [#allocation5]  }
   0xb   :  { %2461 = vmatpush3.msra.mxu1 %v2891_v11  ;;  %2462 = vmatprep.mubr.msk.f32.mxu1 %vm2788_vm1, %v2787_v4  ;;  %v2933_v20 = vld [vmem:[%s3324_s4] ss:$0 sm:$0xff]  ;;  %v40_v59 = vld [vmem:[%s3320_s0 + $0x30] sm:$0xff]  ;;  %v41_v60 = vld [vmem:[%s3320_s0 + $0x38] sm:$0xff]  ;;  %48 = vst.msk [vmem:[#allocation2 + $0x28] sm:$0xff] %vm42_vm0, %v39_v58  ;;  %s2240_s11 = sshll.u32 %s2792_s10, 4  ;;  %s2241_s11 = int_to_ptr.vmem [resolvable:$true] %s2240_s11 }
   0xc   :  { %2441 = vmatpush3.msra.mxu0 %v59_v10  ;;  %2463 = vmatmul.mubr.msk.f32.vlgmr.msra.gmra.mxu1 %vm42_vm0, %v208_v12  ;;  %v51_v13 = vld [vmem:[#allocation2] sm:$0xff]  ;;  %49 = vst.msk [vmem:[#allocation2 + $0x30] sm:$0xff] %vm42_vm0, %v40_v59  ;;  %50 = vst.msk [vmem:[#allocation2 + $0x38] sm:$0xff] %vm42_vm0, %v41_v60  ;;  %p2770_p1 = scmp.lt.s32.totalorder %s2241_s11, %s2241_s11 }
   0xd   :  { %2465 = vmatprep.subr.mxu1 %v2787_v4  ;;  %2473 = vmatprep.mubr.msk.f32.mxu1 %vm2788_vm1, %v2787_v4  ;;  %v38_v57 = vld [vmem:[%s3320_s0 + $0x20] sm:$0xff] }
   0xe   :  { %2442 = vmatprep.mubr.msk.f32.mxu0 %vm42_vm0, %v51_v13  ;;  %v52_v14 = vld [vmem:[#allocation2 + $0x8] sm:$0xff]  ;;  %2466 = vmatpush3.msra.mxu1 %v2854_v2  ;;  %47 = vst.msk [vmem:[#allocation2 + $0x20] sm:$0xff] %vm42_vm0, %v38_v57 }
   0xf   :  { %2443 = vmatmul.mubr.msk.f32.vlgmr.msra.gmra.mxu0 %vm42_vm0, %v52_v14  ;;  %2467 = vmatprep.subr.mxu1 %v2787_v4 }
  0x10   :  { %2468 = vmatpush3.msra.mxu1 %v2863_v5  ;;  %2476 = vmatprep.subr.mxu0 %v2787_v4 }
  0x11   :  { %2469 = vmatprep.subr.mxu1 %v2787_v4  ;;  %2477 = vmatpush3.msra.mxu0 %v2854_v2  ;;  %v53_v62 = vld [vmem:[#allocation2 + $0x10] sm:$0xff]  ;;  %v54_v63 = vld [vmem:[#allocation2 + $0x18] sm:$0xff] }
  0x12   :  { %2470 = vmatpush3.msra.mxu1 %v2876_v8  ;;  %2478 = vmatprep.subr.mxu0 %v2787_v4  ;;  %v56_v1 = vld [vmem:[#allocation2 + $0x28] sm:$0xff] }
  0x13   :  { %2471 = vmatprep.subr.mxu1 %v2787_v4  ;;  %2479 = vmatpush3.msra.mxu0 %v2863_v5  ;;  %v57_v3 = vld [vmem:[#allocation2 + $0x30] sm:$0xff]  ;;  %v58_v6 = vld [vmem:[#allocation2 + $0x38] sm:$0xff] }
  0x14   :  { %2472 = vmatpush3.msra.mxu1 %v2891_v11  ;;  %2480 = vmatprep.subr.mxu0 %v2787_v4 }
  0x15   :  { %2481 = vmatpush3.msra.mxu0 %v2876_v8  ;;  %2487 = vmatprep.subr.mxu1 %v2787_v4  ;;  %v55_v0 = vld [vmem:[#allocation2 + $0x20] sm:$0xff] }
  0x16   :  { %2482 = vmatprep.subr.mxu0 %v2787_v4  ;;  %2445 = vmatprep.mubr.msk.f32.mxu0 %vm42_vm0, %v53_v62 }
  0x17   :  { %2483 = vmatpush3.msra.mxu0 %v2891_v11 }
  0x18   :  { %2498 = vmatprep.subr.mxu0 %v2787_v4  ;;  %2446 = vmatmul.mubr.msk.f32.gmra.mxu0 %vm42_vm0, %v54_v63 }
  0x19   :  { %2448 = vmatprep.mubr.msk.f32.mxu0 %vm42_vm0, %v55_v0 }
  0x1c   :  { %2449 = vmatmul.mubr.msk.f32.gmra.mxu0 %vm42_vm0, %v56_v1 }
  0x1d   :  { %2451 = vmatprep.mubr.msk.f32.mxu0 %vm42_vm0, %v57_v3 }
  0x20   :  { %2452 = vmatmul.mubr.msk.f32.gmra.mxu0 %vm42_vm0, %v58_v6 }
  0x21   :  { %2484 = vmatprep.mubr.msk.f32.mxu0 %vm2788_vm1, %v2787_v4 }
  0xcc   :  { %v290_v16 = vpop.f32.mrf.mxu1 }
  0xcd   :  { %v291_v17 = vadd.f32 %v2927_v15, %v290_v16 }
  0xce   :  { %v2464_v18 = vpop.f32.mrf.mxu1 }
  0xcf   :  { %v2444_v19 = vpop.f32.mrf.mxu0  ;;  %302 = vrot.lane.b32.xlu0 %v291_v17, %s2789_s15 }
  0xd0   :  { %v166_v21 = vadd.f32 %v2444_v19, %v2933_v20 }
  0xd1   :  { %v160_v22 = vpop.f32.mrf.mxu0 }
  0xd2   :  { %201 = vst.msk [vmem:[#allocation3 + $0x8] sm:$0xff] %vm199_vm2, %v166_v21  ;;  %v161_v23 = vadd.f32 %v2933_v20, %v160_v22 }
  0xd4   :  { %200 = vst.msk [vmem:[#allocation3] sm:$0xff] %vm199_vm2, %v161_v23 }
  0xd8   :  { %v2447_v14 = vpop.f32.mrf.mxu0 }
  0xd9   :  { %v329_v45 = vld [vmem:[#allocation3 + $0x8] sm:$0xff]  ;;  %v176_v16 = vadd.f32 %v2447_v14, %v2933_v20 }
  0xdb   :  { %v209_v24 = vld [vmem:[#allocation3] sm:$0xff]  ;;  %203 = vst.msk [vmem:[#allocation3 + $0x18] sm:$0xff] %vm199_vm2, %v176_v16 }
  0xdc   :  { %v294_v25 = vadd.f32 %v291_v17, %v209_v24  ;;  %v170_v17 = vpop.f32.mrf.mxu0 }
  0xdd   :  { %v171_v18 = vadd.f32 %v2933_v20, %v170_v17 }
  0xde   :  { %v2264_v26 = vmul.f32 -1.442695, %v294_v25  ;;  %v2450_v19 = vpop.f32.mrf.mxu0 }
  0xdf   :  { %202 = vst.msk [vmem:[#allocation3 + $0x10] sm:$0xff] %vm199_vm2, %v171_v18  ;;  %v186_v21 = vadd.f32 %v2450_v19, %v2933_v20 }
  0xe0   :  { %2669 = vpow2.f32 %v2264_v26  ;;  %v180_v22 = vpop.f32.mrf.mxu0 }
  0xe1   :  { %205 = vst.msk [vmem:[#allocation3 + $0x28] sm:$0xff] %vm199_vm2, %v186_v21  ;;  %v181_v23 = vadd.f32 %v2933_v20, %v180_v22 }
  0xe3   :  { %204 = vst.msk [vmem:[#allocation3 + $0x20] sm:$0xff] %vm199_vm2, %v181_v23 }
  0xed   :  { %v2670_v27 = vpop.eup %2669 }
  0xee   :  { %v298_v28 = vadd.f32 1.0, %v2670_v27 }
  0xf0   :  { %2671 = vrcp.f32 %v298_v28 }
  0xfd   :  { %v2672_v29 = vpop.eup %2671 }
  0xfe   :  { %v312_v36 = vsub.f32 1.0, %v2672_v29 }
 0x141   :  { %v303_v30 = vpop.permute.xlu0 %302 }
 0x142   :  { %v305_v31 = vmul.f32 %v2672_v29, %v303_v30 }
 0x144   :  { %307 = vrot.lane.b32.xlu0 %v305_v31, %s2789_s15  ;;  %v446_v31 = vld [vmem:[#allocation3 + $0x10] sm:$0xff] }
 0x1b6   :  { %v308_v32 = vpop.permute.xlu0 %307 }
 0x1b7   :  { %v310_v33 = vadd.f32 %v308_v32, %v209_v24  ;;  %v2453_v24 = vpop.f32.mrf.mxu0 }
 0x1b8   :  { %v196_v25 = vadd.f32 %v2453_v24, %v2933_v20 }
 0x1b9   :  { %2673 = vtanh.f32 %v310_v33  ;;  %v190_v26 = vpop.f32.mrf.mxu0 }
 0x1ba   :  { %207 = vst.msk [vmem:[#allocation3 + $0x38] sm:$0xff] %vm199_vm2, %v196_v25  ;;  %v191_v27 = vadd.f32 %v2933_v20, %v190_v26 }
 0x1bc   :  { %206 = vst.msk [vmem:[#allocation3 + $0x30] sm:$0xff] %vm199_vm2, %v191_v27 }
 0x1c6   :  { %v2674_v34 = vpop.eup %2673 }
 0x1c7   :  { %314 = vrot.lane.b32.xlu1 %v2674_v34, %s2790_s16 }
 0x1cb   :  { %318 = vrot.lane.b32.xlu1 %v208_v12, %s2791_s7 }
 0x239   :  { %v315_v35 = vpop.permute.xlu1 %314 }
 0x23a   :  { %v317_v38 = vmul.f32 %v315_v35, %v312_v36 }
 0x23d   :  { %v319_v37 = vpop.permute.xlu1 %318 }
 0x23e   :  { %v321_v39 = vmul.f32 %v2672_v29, %v319_v37 }
 0x240   :  { %v322_v40 = vadd.f32 %v321_v39, %v317_v38 }
 0x242   :  { %324 = vrot.lane.b32.xlu0 %v322_v40, %s2790_s16 }
 0x2b4   :  { %v325_v41 = vpop.permute.xlu0 %324 }
 0x2b5   :  { %327 = vst.msk [vmem:[#allocation2] sm:$0xff] %vm42_vm0, %v325_v41  ;;  %2474 = vmatmul.mubr.msk.f32.vlgmr.msra.gmra.mxu1 %vm42_vm0, %v325_v41 }
 0x2b6   :  { %2488 = vmatpush3.msra.mxu1 %v2854_v2  ;;  %2495 = vmatprep.mubr.msk.f32.mxu1 %vm2788_vm1, %v2787_v4 }
 0x2b7   :  { %2489 = vmatprep.subr.mxu1 %v2787_v4 }
 0x2b8   :  { %2490 = vmatpush3.msra.mxu1 %v2863_v5 }
 0x2b9   :  { %2491 = vmatprep.subr.mxu1 %v2787_v4 }
 0x2ba   :  { %2492 = vmatpush3.msra.mxu1 %v2876_v8 }
 0x2bb   :  { %2493 = vmatprep.subr.mxu1 %v2787_v4 }
 0x2bc   :  { %2494 = vmatpush3.msra.mxu1 %v2891_v11 }
 0x2bd   :  { %2509 = vmatprep.subr.mxu1 %v2787_v4 }
 0x375   :  { %v409_v42 = vpop.f32.mrf.mxu1 }
 0x376   :  { %v410_v43 = vadd.f32 %v2927_v15, %v409_v42 }
 0x377   :  { %v2475_v44 = vpop.f32.mrf.mxu1 }
 0x378   :  { %421 = vrot.lane.b32.xlu1 %v410_v43, %s2789_s15  ;;  %v413_v46 = vadd.f32 %v410_v43, %v329_v45 }
 0x37a   :  { %v2267_v47 = vmul.f32 -1.442695, %v413_v46 }
 0x37c   :  { %2675 = vpow2.f32 %v2267_v47 }
 0x389   :  { %v2676_v48 = vpop.eup %2675 }
 0x38a   :  { %v417_v49 = vadd.f32 1.0, %v2676_v48 }
 0x38c   :  { %2677 = vrcp.f32 %v417_v49 }
 0x399   :  { %v2678_v50 = vpop.eup %2677 }
 0x39a   :  { %v431_v7 = vsub.f32 1.0, %v2678_v50  ;;  %v437_v10 = vmul.f32 %v2678_v50, %v322_v40 }
 0x3ea   :  { %v422_v51 = vpop.permute.xlu1 %421 }
 0x3eb   :  { %v424_v52 = vmul.f32 %v2678_v50, %v422_v51  ;;  %v563_v51 = vld [vmem:[#allocation3 + $0x18] sm:$0xff] }
 0x3ed   :  { %426 = vrot.lane.b32.xlu0 %v424_v52, %s2789_s15 }
 0x45f   :  { %v427_v53 = vpop.permute.xlu0 %426 }
 0x460   :  { %v429_v54 = vadd.f32 %v427_v53, %v329_v45 }
 0x462   :  { %2679 = vtanh.f32 %v429_v54 }
 0x46f   :  { %v2680_v61 = vpop.eup %2679 }
 0x470   :  { %433 = vrot.lane.b32.xlu1 %v2680_v61, %s2790_s16 }
 0x4e2   :  { %v434_v9 = vpop.permute.xlu1 %433 }
 0x4e3   :  { %v436_v12 = vmul.f32 %v434_v9, %v431_v7 }
 0x4e5   :  { %v438_v13 = vadd.f32 %v437_v10, %v436_v12  ;;  %v680_v12 = vld [vmem:[#allocation3 + $0x20] sm:$0xff] }
 0x4e7   :  { %440 = vrot.lane.b32.xlu0 %v438_v13, %s2790_s16 }
 0x559   :  { %v441_v28 = vpop.permute.xlu0 %440 }
 0x55a   :  { %444 = vst.msk [vmem:[#allocation2 + $0x8] sm:$0xff] %vm42_vm0, %v441_v28  ;;  %2485 = vmatmul.mubr.msk.f32.vlgmr.msra.gmra.mxu0 %vm42_vm0, %v441_v28 }
 0x55b   :  { %2499 = vmatpush3.msra.mxu0 %v2854_v2  ;;  %2506 = vmatprep.mubr.msk.f32.mxu0 %vm2788_vm1, %v2787_v4 }
 0x55c   :  { %2500 = vmatprep.subr.mxu0 %v2787_v4 }
 0x55d   :  { %2501 = vmatpush3.msra.mxu0 %v2863_v5 }
 0x55e   :  { %2502 = vmatprep.subr.mxu0 %v2787_v4 }
 0x55f   :  { %2503 = vmatpush3.msra.mxu0 %v2876_v8 }
 0x560   :  { %2504 = vmatprep.subr.mxu0 %v2787_v4 }
 0x561   :  { %2505 = vmatpush3.msra.mxu0 %v2891_v11 }
 0x562   :  { %2520 = vmatprep.subr.mxu0 %v2787_v4 }
 0x61a   :  { %v526_v20 = vpop.f32.mrf.mxu0 }
 0x61b   :  { %v527_v29 = vadd.f32 %v2927_v15, %v526_v20 }
 0x61c   :  { %v2486_v30 = vpop.f32.mrf.mxu0 }
 0x61d   :  { %538 = vrot.lane.b32.xlu1 %v527_v29, %s2789_s15  ;;  %v530_v32 = vadd.f32 %v527_v29, %v446_v31 }
 0x61f   :  { %v2270_v33 = vmul.f32 -1.442695, %v530_v32  ;;  %v797_v32 = vld [vmem:[#allocation3 + $0x28] sm:$0xff] }
 0x621   :  { %2681 = vpow2.f32 %v2270_v33 }
 0x62e   :  { %v2682_v34 = vpop.eup %2681 }
 0x62f   :  { %v534_v35 = vadd.f32 1.0, %v2682_v34 }
 0x631   :  { %2683 = vrcp.f32 %v534_v35 }
 0x63e   :  { %v2684_v36 = vpop.eup %2683 }
 0x63f   :  { %v548_v42 = vsub.f32 1.0, %v2684_v36  ;;  %v554_v44 = vmul.f32 %v2684_v36, %v438_v13 }
 0x68f   :  { %v539_v37 = vpop.permute.xlu1 %538 }
 0x690   :  { %v541_v38 = vmul.f32 %v2684_v36, %v539_v37 }
 0x692   :  { %543 = vrot.lane.b32.xlu0 %v541_v38, %s2789_s15 }
 0x704   :  { %v544_v39 = vpop.permute.xlu0 %543 }
 0x705   :  { %v546_v40 = vadd.f32 %v544_v39, %v446_v31  ;;  %v2289_v39 = vld [vmem:[%s3322_s2 + $0x38] sm:$0xff] }
 0x707   :  { %2685 = vtanh.f32 %v546_v40 }
 0x714   :  { %v2686_v41 = vpop.eup %2685 }
 0x715   :  { %550 = vrot.lane.b32.xlu1 %v2686_v41, %s2790_s16 }
 0x787   :  { %v551_v43 = vpop.permute.xlu1 %550 }
 0x788   :  { %v553_v45 = vmul.f32 %v551_v43, %v548_v42 }
 0x78a   :  { %v555_v46 = vadd.f32 %v554_v44, %v553_v45 }
 0x78c   :  { %557 = vrot.lane.b32.xlu0 %v555_v46, %s2790_s16 }
 0x7fe   :  { %v558_v47 = vpop.permute.xlu0 %557 }
 0x7ff   :  { %561 = vst.msk [vmem:[#allocation2 + $0x10] sm:$0xff] %vm42_vm0, %v558_v47  ;;  %2496 = vmatmul.mubr.msk.f32.vlgmr.msra.gmra.mxu1 %vm42_vm0, %v558_v47  ;;  %v2288_v47 = vld [vmem:[%s3322_s2 + $0x30] sm:$0xff] }
 0x800   :  { %2510 = vmatpush3.msra.mxu1 %v2854_v2  ;;  %2517 = vmatprep.mubr.msk.f32.mxu1 %vm2788_vm1, %v2787_v4 }
 0x801   :  { %2511 = vmatprep.subr.mxu1 %v2787_v4 }
 0x802   :  { %2512 = vmatpush3.msra.mxu1 %v2863_v5 }
 0x803   :  { %2513 = vmatprep.subr.mxu1 %v2787_v4 }
 0x804   :  { %2514 = vmatpush3.msra.mxu1 %v2876_v8 }
 0x805   :  { %2515 = vmatprep.subr.mxu1 %v2787_v4 }
 0x806   :  { %2516 = vmatpush3.msra.mxu1 %v2891_v11 }
 0x807   :  { %2531 = vmatprep.subr.mxu1 %v2787_v4 }
 0x8bf   :  { %v643_v48 = vpop.f32.mrf.mxu1 }
 0x8c0   :  { %v644_v49 = vadd.f32 %v2927_v15, %v643_v48  ;;  %v1148_v48 = vld [vmem:[#allocation2] sm:$0xff] }
 0x8c1   :  { %v2497_v50 = vpop.f32.mrf.mxu1 }
 0x8c2   :  { %655 = vrot.lane.b32.xlu1 %v644_v49, %s2789_s15  ;;  %v647_v52 = vadd.f32 %v644_v49, %v563_v51  ;;  %v2287_v49 = vld [vmem:[%s3322_s2 + $0x28] sm:$0xff]  ;;  %v2286_v50 = vld [vmem:[%s3322_s2 + $0x20] sm:$0xff] }
 0x8c4   :  { %v2273_v53 = vmul.f32 -1.442695, %v647_v52  ;;  %v1150_v52 = vld [vmem:[#allocation2 + $0x10] sm:$0xff] }
 0x8c6   :  { %2687 = vpow2.f32 %v2273_v53 }
 0x8d3   :  { %v2688_v54 = vpop.eup %2687 }
 0x8d4   :  { %v651_v55 = vadd.f32 1.0, %v2688_v54 }
 0x8d6   :  { %2689 = vrcp.f32 %v651_v55 }
 0x8e3   :  { %v2690_v56 = vpop.eup %2689 }
 0x8e4   :  { %v665_v62 = vsub.f32 1.0, %v2690_v56  ;;  %v671_v0 = vmul.f32 %v2690_v56, %v555_v46 }
 0x934   :  { %v656_v57 = vpop.permute.xlu1 %655 }
 0x935   :  { %v658_v58 = vmul.f32 %v2690_v56, %v656_v57 }
 0x937   :  { %660 = vrot.lane.b32.xlu0 %v658_v58, %s2789_s15 }
 0x9a9   :  { %v661_v59 = vpop.permute.xlu0 %660 }
 0x9aa   :  { %v663_v60 = vadd.f32 %v661_v59, %v563_v51  ;;  %v1149_v51 = vld [vmem:[#allocation2 + $0x8] sm:$0xff]  ;;  %v3101_v59 = vld [vmem:[%s3324_s4 + $0x1] ss:$0 sm:$0xff] }
 0x9ac   :  { %2691 = vtanh.f32 %v663_v60 }
 0x9b9   :  { %v2692_v61 = vpop.eup %2691 }
 0x9ba   :  { %667 = vrot.lane.b32.xlu1 %v2692_v61, %s2790_s16 }
 0xa2c   :  { %v668_v63 = vpop.permute.xlu1 %667 }
 0xa2d   :  { %v670_v1 = vmul.f32 %v668_v63, %v665_v62 }
 0xa2f   :  { %v672_v3 = vadd.f32 %v671_v0, %v670_v1 }
 0xa31   :  { %674 = vrot.lane.b32.xlu0 %v672_v3, %s2790_s16 }
 0xaa3   :  { %v675_v6 = vpop.permute.xlu0 %674 }
 0xaa4   :  { %678 = vst.msk [vmem:[#allocation2 + $0x18] sm:$0xff] %vm42_vm0, %v675_v6  ;;  %2507 = vmatmul.mubr.msk.f32.vlgmr.msra.gmra.mxu0 %vm42_vm0, %v675_v6 }
 0xaa5   :  { %2521 = vmatpush3.msra.mxu0 %v2854_v2  ;;  %2528 = vmatprep.mubr.msk.f32.mxu0 %vm2788_vm1, %v2787_v4 }
 0xaa6   :  { %2522 = vmatprep.subr.mxu0 %v2787_v4 }
 0xaa7   :  { %2523 = vmatpush3.msra.mxu0 %v2863_v5 }
 0xaa8   :  { %2524 = vmatprep.subr.mxu0 %v2787_v4 }
 0xaa9   :  { %2525 = vmatpush3.msra.mxu0 %v2876_v8 }
 0xaaa   :  { %2526 = vmatprep.subr.mxu0 %v2787_v4 }
 0xaab   :  { %2527 = vmatpush3.msra.mxu0 %v2891_v11  ;;  %v1151_v53 = vld [vmem:[#allocation2 + $0x18] sm:$0xff] }
 0xaac   :  { %2542 = vmatprep.subr.mxu0 %v2289_v39 }
 0xb64   :  { %v760_v7 = vpop.f32.mrf.mxu0 }
 0xb65   :  { %v761_v9 = vadd.f32 %v2927_v15, %v760_v7 }
 0xb66   :  { %v2508_v10 = vpop.f32.mrf.mxu0 }
 0xb67   :  { %772 = vrot.lane.b32.xlu1 %v761_v9, %s2789_s15  ;;  %v764_v13 = vadd.f32 %v761_v9, %v680_v12 }
 0xb69   :  { %v2276_v14 = vmul.f32 -1.442695, %v764_v13  ;;  %v914_v13 = vld [vmem:[#allocation3 + $0x30] sm:$0xff] }
 0xb6b   :  { %2693 = vpow2.f32 %v2276_v14 }
 0xb78   :  { %v2694_v16 = vpop.eup %2693 }
 0xb79   :  { %v768_v17 = vadd.f32 1.0, %v2694_v16 }
 0xb7b   :  { %2695 = vrcp.f32 %v768_v17 }
 0xb88   :  { %v2696_v18 = vpop.eup %2695 }
 0xb89   :  { %v782_v25 = vsub.f32 1.0, %v2696_v18  ;;  %v788_v27 = vmul.f32 %v2696_v18, %v672_v3 }
 0xbd9   :  { %v773_v19 = vpop.permute.xlu1 %772 }
 0xbda   :  { %v775_v21 = vmul.f32 %v2696_v18, %v773_v19 }
 0xbdc   :  { %777 = vrot.lane.b32.xlu0 %v775_v21, %s2789_s15 }
 0xc4e   :  { %v778_v22 = vpop.permute.xlu0 %777 }
 0xc4f   :  { %v780_v23 = vadd.f32 %v778_v22, %v680_v12 }
 0xc51   :  { %2697 = vtanh.f32 %v780_v23 }
 0xc5e   :  { %v2698_v24 = vpop.eup %2697 }
 0xc5f   :  { %784 = vrot.lane.b32.xlu1 %v2698_v24, %s2790_s16 }
 0xcd1   :  { %v785_v26 = vpop.permute.xlu1 %784 }
 0xcd2   :  { %v787_v28 = vmul.f32 %v785_v26, %v782_v25  ;;  %v3120_v26 = vld [vmem:[%s3323_s3 + $0x38] sm:$0xff] }
 0xcd4   :  { %v789_v20 = vadd.f32 %v788_v27, %v787_v28  ;;  %v3126_v27 = vld [vmem:[%s3323_s3 + $0x30] sm:$0xff]  ;;  %v3133_v28 = vld [vmem:[%s3323_s3 + $0x28] sm:$0xff] }
 0xcd6   :  { %791 = vrot.lane.b32.xlu0 %v789_v20, %s2790_s16 }
 0xd48   :  { %v792_v29 = vpop.permute.xlu0 %791 }
 0xd49   :  { %795 = vst.msk [vmem:[#allocation2 + $0x20] sm:$0xff] %vm42_vm0, %v792_v29  ;;  %2518 = vmatmul.mubr.msk.f32.vlgmr.msra.gmra.mxu1 %vm42_vm0, %v792_v29 }
 0xd4a   :  { %2532 = vmatpush3.msra.mxu1 %v2854_v2  ;;  %2539 = vmatprep.mubr.msk.f32.mxu1 %vm2788_vm1, %v2787_v4 }
 0xd4b   :  { %2533 = vmatprep.subr.mxu1 %v2787_v4 }
 0xd4c   :  { %2534 = vmatpush3.msra.mxu1 %v2863_v5 }
 0xd4d   :  { %2535 = vmatprep.subr.mxu1 %v2787_v4 }
 0xd4e   :  { %2536 = vmatpush3.msra.mxu1 %v2876_v8 }
 0xd4f   :  { %2537 = vmatprep.subr.mxu1 %v2787_v4 }
 0xd50   :  { %2538 = vmatpush3.msra.mxu1 %v2891_v11  ;;  %v1152_v54 = vld [vmem:[#allocation2 + $0x20] sm:$0xff] }
 0xd51   :  { %2562 = vmatprep.subr.mxu1 %v2787_v4 }
 0xe09   :  { %v877_v30 = vpop.f32.mrf.mxu1 }
 0xe0a   :  { %v878_v2 = vadd.f32 %v2927_v15, %v877_v30 }
 0xe0b   :  { %v2519_v31 = vpop.f32.mrf.mxu1 }
 0xe0c   :  { %889 = vrot.lane.b32.xlu1 %v878_v2, %s2789_s15  ;;  %v881_v33 = vadd.f32 %v878_v2, %v797_v32 }
 0xe0e   :  { %v2279_v34 = vmul.f32 -1.442695, %v881_v33 }
 0xe10   :  { %2699 = vpow2.f32 %v2279_v34  ;;  %v2300_v34 = vld [vmem:[%s3321_s1 + $0x8] sm:$0xff] }
 0xe1d   :  { %v2700_v5 = vpop.eup %2699 }
 0xe1e   :  { %v885_v35 = vadd.f32 1.0, %v2700_v5 }
 0xe20   :  { %2701 = vrcp.f32 %v885_v35 }
 0xe2d   :  { %v2702_v8 = vpop.eup %2701 }
 0xe2e   :  { %v899_v41 = vsub.f32 1.0, %v2702_v8  ;;  %v905_v43 = vmul.f32 %v2702_v8, %v789_v20  ;;  %v3140_v20 = vld [vmem:[%s3323_s3 + $0x20] sm:$0xff] }
 0xe7e   :  { %v890_v36 = vpop.permute.xlu1 %889 }
 0xe7f   :  { %v892_v37 = vmul.f32 %v2702_v8, %v890_v36  ;;  %v3180_v36 = vld [vmem:[%s3325_s5 + $0x1] ss:$0 sm:$0xff] }
 0xe81   :  { %894 = vrot.lane.b32.xlu0 %v892_v37, %s2789_s15 }
 0xef3   :  { %v895_v11 = vpop.permute.xlu0 %894 }
 0xef4   :  { %v897_v38 = vadd.f32 %v895_v11, %v797_v32 }
 0xef6   :  { %2703 = vtanh.f32 %v897_v38 }
 0xf03   :  { %v2704_v40 = vpop.eup %2703 }
 0xf04   :  { %901 = vrot.lane.b32.xlu1 %v2704_v40, %s2790_s16 }
 0xf76   :  { %v902_v42 = vpop.permute.xlu1 %901 }
 0xf77   :  { %v904_v44 = vmul.f32 %v902_v42, %v899_v41 }
 0xf79   :  { %v3074_v45 = vadd.f32 %v905_v43, %v904_v44 }
 0xf7b   :  { %908 = vrot.lane.b32.xlu0 %v3074_v45, %s2790_s16 }
 0xfed   :  { %v909_v46 = vpop.permute.xlu0 %908 }
 0xfee   :  { %912 = vst.msk [vmem:[#allocation2 + $0x28] sm:$0xff] %vm42_vm0, %v909_v46  ;;  %2529 = vmatmul.mubr.msk.f32.vlgmr.msra.gmra.mxu0 %vm42_vm0, %v909_v46 }
 0xfef   :  { %2543 = vmatpush3.msra.mxu0 %v2289_v39  ;;  %2550 = vmatprep.mubr.msk.f32.mxu0 %vm42_vm0, %v1148_v48  ;;  %v1031_v48 = vld [vmem:[#allocation3 + $0x38] sm:$0xff] }
 0xff0   :  { %2544 = vmatprep.subr.mxu0 %v2288_v47 }
 0xff1   :  { %2545 = vmatpush3.msra.mxu0 %v2288_v47 }
 0xff2   :  { %2546 = vmatprep.subr.mxu0 %v2287_v49 }
 0xff3   :  { %2547 = vmatpush3.msra.mxu0 %v2287_v49 }
 0xff4   :  { %2548 = vmatprep.subr.mxu0 %v2286_v50 }
 0xff5   :  { %2549 = vmatpush3.msra.mxu0 %v2286_v50  ;;  %v1153_v55 = vld [vmem:[#allocation2 + $0x28] sm:$0xff] }
 0xff6   :  { %2551 = vmatmul.mubr.msk.f32.vlgmr.msra.gmra.mxu0 %vm42_vm0, %v1149_v51  ;;  %2584 = vmatprep.subr.mxu0 %v2787_v4 }
 0xff7   :  { %2553 = vmatprep.mubr.msk.f32.mxu0 %vm42_vm0, %v1150_v52  ;;  %2585 = vmatpush3.msra.mxu0 %v3120_v26 }
 0xff8   :  { %2586 = vmatprep.subr.mxu0 %v2787_v4 }
 0xff9   :  { %2587 = vmatpush3.msra.mxu0 %v3126_v27 }
 0xffa   :  { %2554 = vmatmul.mubr.msk.f32.gmra.mxu0 %vm42_vm0, %v1151_v53  ;;  %2588 = vmatprep.subr.mxu0 %v2787_v4 }
 0xffb   :  { %2556 = vmatprep.mubr.msk.f32.mxu0 %vm42_vm0, %v1152_v54  ;;  %2589 = vmatpush3.msra.mxu0 %v3133_v28 }
 0xffc   :  { %2590 = vmatprep.subr.mxu0 %v2787_v4 }
 0xffd   :  { %2591 = vmatpush3.msra.mxu0 %v3140_v20 }
 0xffe   :  { %2557 = vmatmul.mubr.msk.f32.gmra.mxu0 %vm42_vm0, %v1153_v55  ;;  %2606 = vmatprep.subr.mxu0 %v2787_v4 }
0x10ae   :  { %v994_v56 = vpop.f32.mrf.mxu0 }
0x10af   :  { %v995_v57 = vadd.f32 %v2927_v15, %v994_v56 }
0x10b0   :  { %v2530_v58 = vpop.f32.mrf.mxu0 }
0x10b1   :  { %1006 = vrot.lane.b32.xlu1 %v995_v57, %s2789_s15  ;;  %v998_v14 = vadd.f32 %v995_v57, %v914_v13 }
0x10b3   :  { %v2282_v16 = vmul.f32 -1.442695, %v998_v14 }
0x10b5   :  { %2705 = vpow2.f32 %v2282_v16 }
0x10b6   :  { %v2552_v60 = vpop.f32.mrf.mxu0 }
0x10b7   :  { %v1265_v61 = vadd.f32 %v2552_v60, %v3101_v59 }
0x10b8   :  { %v1259_v62 = vpop.f32.mrf.mxu0 }
0x10b9   :  { %1299 = vst.msk [vmem:[#allocation3 + $0x8] sm:$0xff] %vm199_vm2, %v1265_v61  ;;  %v1260_v63 = vadd.f32 %v3101_v59, %v1259_v62 }
0x10ba   :  { %v2555_v0 = vpop.f32.mrf.mxu0 }
0x10bb   :  { %1298 = vst.msk [vmem:[#allocation3] sm:$0xff] %vm199_vm2, %v1260_v63  ;;  %v1275_v1 = vadd.f32 %v2555_v0, %v3101_v59 }
0x10bc   :  { %v1269_v3 = vpop.f32.mrf.mxu0 }
0x10bd   :  { %1301 = vst.msk [vmem:[#allocation3 + $0x18] sm:$0xff] %vm199_vm2, %v1275_v1  ;;  %v1270_v6 = vadd.f32 %v3101_v59, %v1269_v3 }
0x10be   :  { %v2558_v7 = vpop.f32.mrf.mxu0 }
0x10bf   :  { %1300 = vst.msk [vmem:[#allocation3 + $0x10] sm:$0xff] %vm199_vm2, %v1270_v6  ;;  %v1285_v9 = vadd.f32 %v2558_v7, %v3101_v59 }
0x10c0   :  { %v1279_v10 = vpop.f32.mrf.mxu0 }
0x10c1   :  { %1303 = vst.msk [vmem:[#allocation3 + $0x28] sm:$0xff] %vm199_vm2, %v1285_v9  ;;  %v1280_v12 = vadd.f32 %v3101_v59, %v1279_v10 }
0x10c2   :  { %v2706_v17 = vpop.eup %2705  ;;  %v1308_v39 = vld [vmem:[#allocation3] sm:$0xff] }
0x10c3   :  { %1302 = vst.msk [vmem:[#allocation3 + $0x20] sm:$0xff] %vm199_vm2, %v1280_v12  ;;  %v1002_v18 = vadd.f32 1.0, %v2706_v17 }
0x10c5   :  { %2707 = vrcp.f32 %v1002_v18 }
0x10d2   :  { %v2708_v19 = vpop.eup %2707 }
0x10d3   :  { %v1016_v29 = vsub.f32 1.0, %v2708_v19  ;;  %v1022_v2 = vmul.f32 %v2708_v19, %v3074_v45 }
0x1123   :  { %v1007_v21 = vpop.permute.xlu1 %1006 }
0x1124   :  { %v1009_v22 = vmul.f32 %v2708_v19, %v1007_v21 }
0x1126   :  { %1011 = vrot.lane.b32.xlu0 %v1009_v22, %s2789_s15  ;;  %v1424_v22 = vld [vmem:[#allocation3 + $0x8] sm:$0xff] }
0x1198   :  { %v1012_v23 = vpop.permute.xlu0 %1011 }
0x1199   :  { %v1014_v24 = vadd.f32 %v1012_v23, %v914_v13 }
0x119b   :  { %2709 = vtanh.f32 %v1014_v24 }
0x11a8   :  { %v2710_v25 = vpop.eup %2709 }
0x11a9   :  { %1018 = vrot.lane.b32.xlu1 %v2710_v25, %s2790_s16 }
0x121b   :  { %v1019_v30 = vpop.permute.xlu1 %1018 }
0x121c   :  { %v1021_v31 = vmul.f32 %v1019_v30, %v1016_v29 }
0x121e   :  { %v3146_v32 = vadd.f32 %v1022_v2, %v1021_v31 }
0x1220   :  { %1025 = vrot.lane.b32.xlu0 %v3146_v32, %s2790_s16 }
0x1292   :  { %v1026_v33 = vpop.permute.xlu0 %1025 }
0x1293   :  { %1029 = vst.msk [vmem:[#allocation2 + $0x30] sm:$0xff] %vm42_vm0, %v1026_v33  ;;  %2540 = vmatmul.mubr.msk.f32.vlgmr.msra.gmra.mxu1 %vm42_vm0, %v1026_v33 }
0x1294   :  { %2563 = vmatpush3.msra.mxu1 %v3120_v26  ;;  %2570 = vmatprep.mubr.msk.f32.mxu1 %vm2788_vm1, %v2787_v4 }
0x1295   :  { %2564 = vmatprep.subr.mxu1 %v2787_v4 }
0x1296   :  { %2565 = vmatpush3.msra.mxu1 %v3126_v27 }
0x1297   :  { %2566 = vmatprep.subr.mxu1 %v2787_v4 }
0x1298   :  { %2567 = vmatpush3.msra.mxu1 %v3133_v28 }
0x1299   :  { %2568 = vmatprep.subr.mxu1 %v2787_v4 }
0x129a   :  { %2569 = vmatpush3.msra.mxu1 %v3140_v20  ;;  %v1154_v5 = vld [vmem:[#allocation2 + $0x30] sm:$0xff] }
0x129b   :  { %2571 = vmatmul.mubr.msk.f32.vlgmr.msra.gmra.mxu1 %vm42_vm0, %v2300_v34  ;;  %2559 = vmatprep.mubr.msk.f32.mxu0 %vm42_vm0, %v1154_v5 }
0x129c   :  { %2573 = vmatprep.subr.mxu1 %v2787_v4  ;;  %2581 = vmatprep.mubr.msk.f32.mxu1 %vm2788_vm1, %v2787_v4 }
0x129d   :  { %2574 = vmatpush3.msra.mxu1 %v3120_v26 }
0x129e   :  { %2575 = vmatprep.subr.mxu1 %v2787_v4 }
0x129f   :  { %2576 = vmatpush3.msra.mxu1 %v3126_v27 }
0x12a0   :  { %2577 = vmatprep.subr.mxu1 %v2787_v4 }
0x12a1   :  { %2578 = vmatpush3.msra.mxu1 %v3133_v28 }
0x12a2   :  { %2579 = vmatprep.subr.mxu1 %v2787_v4 }
0x12a3   :  { %2580 = vmatpush3.msra.mxu1 %v3140_v20 }
0x12a4   :  { %2595 = vmatprep.subr.mxu1 %v2787_v4 }
0x1353   :  { %v1111_v35 = vpop.f32.mrf.mxu1 }
0x1354   :  { %v1112_v47 = vadd.f32 %v2927_v15, %v1111_v35 }
0x1355   :  { %v2541_v8 = vpop.f32.mrf.mxu1 }
0x1356   :  { %v1115_v49 = vadd.f32 %v1112_v47, %v1031_v48 }
0x1358   :  { %v2285_v50 = vmul.f32 -1.442695, %v1115_v49 }
0x135b   :  { %v1391_v37 = vpop.f32.mrf.mxu1 }
0x135c   :  { %v1392_v11 = vadd.f32 %v3180_v36, %v1391_v37 }
0x135d   :  { %v2572_v38 = vpop.f32.mrf.mxu1 }
0x135e   :  { %1403 = vrot.lane.b32.xlu1 %v1392_v11, %s2789_s15  ;;  %v1395_v40 = vadd.f32 %v1392_v11, %v1308_v39 }
0x1360   :  { %v2308_v41 = vmul.f32 -1.442695, %v1395_v40 }
0x1362   :  { %2711 = vpow2.f32 %v2308_v41 }
0x136f   :  { %v2712_v42 = vpop.eup %2711 }
0x1370   :  { %v1399_v43 = vadd.f32 1.0, %v2712_v42 }
0x1372   :  { %2713 = vrcp.f32 %v1399_v43 }
0x1373   :  { %2715 = vpow2.f32 %v2285_v50 }
0x137f   :  { %v2714_v44 = vpop.eup %2713 }
0x1380   :  { %v2716_v51 = vpop.eup %2715  ;;  %v1413_v62 = vsub.f32 1.0, %v2714_v44 }
0x1381   :  { %v1119_v52 = vadd.f32 1.0, %v2716_v51 }
0x1383   :  { %2717 = vrcp.f32 %v1119_v52 }
0x1390   :  { %v2718_v56 = vpop.eup %2717 }
0x1391   :  { %v1133_v9 = vsub.f32 1.0, %v2718_v56  ;;  %v1139_v12 = vmul.f32 %v2718_v56, %v3146_v32 }
0x13d0   :  { %v1404_v45 = vpop.permute.xlu1 %1403 }
0x13d1   :  { %v1406_v46 = vmul.f32 %v2714_v44, %v1404_v45  ;;  %v1526_v45 = vld [vmem:[#allocation3 + $0x10] sm:$0xff] }
0x13d3   :  { %1408 = vrot.lane.b32.xlu0 %v1406_v46, %s2789_s15 }
0x13d7   :  { %1419 = vrot.lane.b32.xlu0 %v2300_v34, %s2791_s7 }
0x13db   :  { %1123 = vrot.lane.b32.xlu0 %v1112_v47, %s2789_s15 }
0x1445   :  { %v1409_v53 = vpop.permute.xlu0 %1408 }
0x1446   :  { %v1411_v54 = vadd.f32 %v1409_v53, %v1308_v39 }
0x1448   :  { %2719 = vtanh.f32 %v1411_v54 }
0x1449   :  { %v1420_v55 = vpop.permute.xlu0 %1419 }
0x144a   :  { %v1422_v0 = vmul.f32 %v2714_v44, %v1420_v55 }
0x144d   :  { %v1124_v57 = vpop.permute.xlu0 %1123 }
0x144e   :  { %v1126_v58 = vmul.f32 %v2718_v56, %v1124_v57 }
0x1450   :  { %1128 = vrot.lane.b32.xlu0 %v1126_v58, %s2789_s15 }
0x1455   :  { %v2720_v60 = vpop.eup %2719 }
0x1456   :  { %1415 = vrot.lane.b32.xlu1 %v2720_v60, %s2790_s16 }
0x14c2   :  { %v1129_v15 = vpop.permute.xlu0 %1128 }
0x14c3   :  { %v1131_v61 = vadd.f32 %v1129_v15, %v1031_v48 }
0x14c5   :  { %2721 = vtanh.f32 %v1131_v61 }
0x14c8   :  { %v1416_v63 = vpop.permute.xlu1 %1415 }
0x14c9   :  { %v1418_v1 = vmul.f32 %v1416_v63, %v1413_v62 }
0x14cb   :  { %v1423_v3 = vadd.f32 %v1422_v0, %v1418_v1  ;;  %v1628_v1 = vld [vmem:[#allocation3 + $0x18] sm:$0xff] }
0x14cd   :  { %1426 = vrot.lane.b32.xlu1 %v1423_v3, %s2790_s16 }
0x14d2   :  { %v2722_v6 = vpop.eup %2721 }
0x14d3   :  { %1135 = vrot.lane.b32.xlu0 %v2722_v6, %s2790_s16 }
0x153f   :  { %v1427_v7 = vpop.permute.xlu1 %1426 }
0x1540   :  { %2582 = vmatmul.mubr.msk.f32.vlgmr.msra.gmra.mxu1 %vm42_vm0, %v1427_v7 }
0x1541   :  { %2596 = vmatpush3.msra.mxu1 %v3120_v26  ;;  %2603 = vmatprep.mubr.msk.f32.mxu1 %vm2788_vm1, %v2787_v4 }
0x1542   :  { %2597 = vmatprep.subr.mxu1 %v2787_v4 }
0x1543   :  { %2598 = vmatpush3.msra.mxu1 %v3126_v27 }
0x1544   :  { %2599 = vmatprep.subr.mxu1 %v2787_v4 }
0x1545   :  { %v1136_v10 = vpop.permute.xlu0 %1135  ;;  %2600 = vmatpush3.msra.mxu1 %v3133_v28 }
0x1546   :  { %v1138_v13 = vmul.f32 %v1136_v10, %v1133_v9  ;;  %2601 = vmatprep.subr.mxu1 %v2787_v4 }
0x1547   :  { %2602 = vmatpush3.msra.mxu1 %v3140_v20 }
0x1548   :  { %v1140_v14 = vadd.f32 %v1139_v12, %v1138_v13  ;;  %2617 = vmatprep.subr.mxu1 %v2787_v4 }
0x154a   :  { %1142 = vrot.lane.b32.xlu0 %v1140_v14, %s2790_s16 }
0x15bc   :  { %v1143_v16 = vpop.permute.xlu0 %1142 }
0x15bd   :  { %1146 = vst.msk [vmem:[#allocation2 + $0x38] sm:$0xff] %vm42_vm0, %v1143_v16  ;;  %1147 = vst.msk [vmem:[#allocation5] sm:$0xff] %vm42_vm0, %v1143_v16 }
0x15c4   :  { %v1155_v17 = vld [vmem:[#allocation2 + $0x38] sm:$0xff] }
0x15c5   :  { %2560 = vmatmul.mubr.msk.f32.gmra.mxu0 %vm42_vm0, %v1155_v17 }
0x15c6   :  { %2592 = vmatprep.mubr.msk.f32.mxu0 %vm2788_vm1, %v2787_v4 }
0x1600   :  { %v1496_v18 = vpop.f32.mrf.mxu1 }
0x1601   :  { %v1497_v19 = vadd.f32 %v3180_v36, %v1496_v18 }
0x1602   :  { %v2583_v21 = vpop.f32.mrf.mxu1 }
0x1603   :  { %1508 = vrot.lane.b32.xlu1 %v1497_v19, %s2789_s15  ;;  %v1500_v23 = vadd.f32 %v1497_v19, %v1424_v22 }
0x1605   :  { %v2310_v24 = vmul.f32 -1.442695, %v1500_v23 }
0x1607   :  { %2723 = vpow2.f32 %v2310_v24 }
0x1614   :  { %v2724_v25 = vpop.eup %2723 }
0x1615   :  { %v1504_v29 = vadd.f32 1.0, %v2724_v25 }
0x1617   :  { %2725 = vrcp.f32 %v1504_v29 }
0x1624   :  { %v2726_v30 = vpop.eup %2725 }
0x1625   :  { %v1518_v11 = vsub.f32 1.0, %v2726_v30  ;;  %v1524_v39 = vmul.f32 %v2726_v30, %v1423_v3 }
0x1675   :  { %v1509_v2 = vpop.permute.xlu1 %1508 }
0x1676   :  { %v1511_v31 = vmul.f32 %v2726_v30, %v1509_v2  ;;  %v1730_v2 = vld [vmem:[#allocation3 + $0x20] sm:$0xff] }
0x1678   :  { %1513 = vrot.lane.b32.xlu1 %v1511_v31, %s2789_s15 }
0x1685   :  { %v2561_v32 = vpop.f32.mrf.mxu0 }
0x1686   :  { %v1295_v33 = vadd.f32 %v2561_v32, %v3101_v59 }
0x1687   :  { %v1289_v34 = vpop.f32.mrf.mxu0 }
0x1688   :  { %1305 = vst.msk [vmem:[#allocation3 + $0x38] sm:$0xff] %vm199_vm2, %v1295_v33  ;;  %v1290_v5 = vadd.f32 %v3101_v59, %v1289_v34 }
0x168a   :  { %1304 = vst.msk [vmem:[#allocation3 + $0x30] sm:$0xff] %vm199_vm2, %v1290_v5 }
0x16ea   :  { %v1514_v35 = vpop.permute.xlu1 %1513 }
0x16eb   :  { %v1516_v8 = vadd.f32 %v1514_v35, %v1424_v22 }
0x16ed   :  { %2727 = vtanh.f32 %v1516_v8 }
0x16fa   :  { %v2728_v37 = vpop.eup %2727 }
0x16fb   :  { %1520 = vrot.lane.b32.xlu1 %v2728_v37, %s2790_s16 }
0x176d   :  { %v1521_v38 = vpop.permute.xlu1 %1520 }
0x176e   :  { %v1523_v40 = vmul.f32 %v1521_v38, %v1518_v11 }
0x1770   :  { %v1525_v41 = vadd.f32 %v1524_v39, %v1523_v40 }
0x1772   :  { %1528 = vrot.lane.b32.xlu1 %v1525_v41, %s2790_s16 }
0x17e4   :  { %v1529_v42 = vpop.permute.xlu1 %1528 }
0x17e5   :  { %2593 = vmatmul.mubr.msk.f32.vlgmr.msra.gmra.mxu0 %vm42_vm0, %v1529_v42 }
0x17e6   :  { %2607 = vmatpush3.msra.mxu0 %v3120_v26  ;;  %2614 = vmatprep.mubr.msk.f32.mxu0 %vm2788_vm1, %v2787_v4 }
0x17e7   :  { %2608 = vmatprep.subr.mxu0 %v2787_v4 }
0x17e8   :  { %2609 = vmatpush3.msra.mxu0 %v3126_v27 }
0x17e9   :  { %2610 = vmatprep.subr.mxu0 %v2787_v4 }
0x17ea   :  { %2611 = vmatpush3.msra.mxu0 %v3133_v28 }
0x17eb   :  { %2612 = vmatprep.subr.mxu0 %v2787_v4 }
0x17ec   :  { %2613 = vmatpush3.msra.mxu0 %v3140_v20 }
0x17ed   :  { %2628 = vmatprep.subr.mxu0 %v2787_v4 }
0x18a5   :  { %v1598_v59 = vpop.f32.mrf.mxu0 }
0x18a6   :  { %v1599_v43 = vadd.f32 %v3180_v36, %v1598_v59 }
0x18a7   :  { %v2594_v44 = vpop.f32.mrf.mxu0 }
0x18a8   :  { %1610 = vrot.lane.b32.xlu0 %v1599_v43, %s2789_s15  ;;  %v1602_v46 = vadd.f32 %v1599_v43, %v1526_v45 }
0x18aa   :  { %v2312_v47 = vmul.f32 -1.442695, %v1602_v46 }
0x18ac   :  { %2729 = vpow2.f32 %v2312_v47 }
0x18b9   :  { %v2730_v48 = vpop.eup %2729 }
0x18ba   :  { %v1606_v49 = vadd.f32 1.0, %v2730_v48 }
0x18bc   :  { %2731 = vrcp.f32 %v1606_v49 }
0x18c9   :  { %v2732_v50 = vpop.eup %2731 }
0x18ca   :  { %v1620_v56 = vsub.f32 1.0, %v2732_v50  ;;  %v1626_v58 = vmul.f32 %v2732_v50, %v1525_v41 }
0x191a   :  { %v1611_v51 = vpop.permute.xlu0 %1610 }
0x191b   :  { %v1613_v52 = vmul.f32 %v2732_v50, %v1611_v51 }
0x191d   :  { %1615 = vrot.lane.b32.xlu1 %v1613_v52, %s2789_s15 }
0x198f   :  { %v1616_v53 = vpop.permute.xlu1 %1615 }
0x1990   :  { %v1618_v54 = vadd.f32 %v1616_v53, %v1526_v45 }
0x1992   :  { %2733 = vtanh.f32 %v1618_v54 }
0x199f   :  { %v2734_v55 = vpop.eup %2733 }
0x19a0   :  { %1622 = vrot.lane.b32.xlu0 %v2734_v55, %s2790_s16 }
0x1a12   :  { %v1623_v57 = vpop.permute.xlu0 %1622 }
0x1a13   :  { %v1625_v60 = vmul.f32 %v1623_v57, %v1620_v56 }
0x1a15   :  { %v1627_v15 = vadd.f32 %v1626_v58, %v1625_v60 }
0x1a17   :  { %1630 = vrot.lane.b32.xlu1 %v1627_v15, %s2790_s16 }
0x1a89   :  { %v1631_v61 = vpop.permute.xlu1 %1630 }
0x1a8a   :  { %2604 = vmatmul.mubr.msk.f32.vlgmr.msra.gmra.mxu1 %vm42_vm0, %v1631_v61 }
0x1a8b   :  { %2618 = vmatpush3.msra.mxu1 %v3120_v26  ;;  %2625 = vmatprep.mubr.msk.f32.mxu1 %vm2788_vm1, %v2787_v4 }
0x1a8c   :  { %2619 = vmatprep.subr.mxu1 %v2787_v4 }
0x1a8d   :  { %2620 = vmatpush3.msra.mxu1 %v3126_v27 }
0x1a8e   :  { %2621 = vmatprep.subr.mxu1 %v2787_v4 }
0x1a8f   :  { %2622 = vmatpush3.msra.mxu1 %v3133_v28 }
0x1a90   :  { %2623 = vmatprep.subr.mxu1 %v2787_v4 }
0x1a91   :  { %2624 = vmatpush3.msra.mxu1 %v3140_v20 }
0x1a92   :  { %2639 = vmatprep.subr.mxu1 %v2787_v4 }
0x1b4a   :  { %v1700_v62 = vpop.f32.mrf.mxu1 }
0x1b4b   :  { %v1701_v63 = vadd.f32 %v3180_v36, %v1700_v62 }
0x1b4c   :  { %v2605_v0 = vpop.f32.mrf.mxu1 }
0x1b4d   :  { %1712 = vrot.lane.b32.xlu0 %v1701_v63, %s2789_s15  ;;  %v1704_v3 = vadd.f32 %v1701_v63, %v1628_v1  ;;  %v1934_v63 = vld [vmem:[#allocation3 + $0x30] sm:$0xff] }
0x1b4f   :  { %v2314_v6 = vmul.f32 -1.442695, %v1704_v3 }
0x1b51   :  { %2735 = vpow2.f32 %v2314_v6 }
0x1b5e   :  { %v2736_v7 = vpop.eup %2735 }
0x1b5f   :  { %v1708_v9 = vadd.f32 1.0, %v2736_v7 }
0x1b61   :  { %2737 = vrcp.f32 %v1708_v9 }
0x1b6e   :  { %v2738_v10 = vpop.eup %2737 }
0x1b6f   :  { %v1722_v18 = vsub.f32 1.0, %v2738_v10  ;;  %v1728_v21 = vmul.f32 %v2738_v10, %v1627_v15 }
0x1bbf   :  { %v1713_v12 = vpop.permute.xlu0 %1712 }
0x1bc0   :  { %v1715_v13 = vmul.f32 %v2738_v10, %v1713_v12 }
0x1bc2   :  { %1717 = vrot.lane.b32.xlu1 %v1715_v13, %s2789_s15 }
0x1c34   :  { %v1718_v14 = vpop.permute.xlu1 %1717 }
0x1c35   :  { %v1720_v16 = vadd.f32 %v1718_v14, %v1628_v1 }
0x1c37   :  { %2739 = vtanh.f32 %v1720_v16 }
0x1c44   :  { %v2740_v17 = vpop.eup %2739 }
0x1c45   :  { %1724 = vrot.lane.b32.xlu0 %v2740_v17, %s2790_s16 }
0x1cb7   :  { %v1725_v19 = vpop.permute.xlu0 %1724 }
0x1cb8   :  { %v1727_v22 = vmul.f32 %v1725_v19, %v1722_v18 }
0x1cba   :  { %v1729_v23 = vadd.f32 %v1728_v21, %v1727_v22 }
0x1cbc   :  { %1732 = vrot.lane.b32.xlu1 %v1729_v23, %s2790_s16 }
0x1d2e   :  { %v1733_v24 = vpop.permute.xlu1 %1732 }
0x1d2f   :  { %2615 = vmatmul.mubr.msk.f32.vlgmr.msra.gmra.mxu0 %vm42_vm0, %v1733_v24 }
0x1d30   :  { %2629 = vmatpush3.msra.mxu0 %v3120_v26  ;;  %2636 = vmatprep.mubr.msk.f32.mxu0 %vm2788_vm1, %v2787_v4 }
0x1d31   :  { %2630 = vmatprep.subr.mxu0 %v2787_v4 }
0x1d32   :  { %2631 = vmatpush3.msra.mxu0 %v3126_v27 }
0x1d33   :  { %2632 = vmatprep.subr.mxu0 %v2787_v4 }
0x1d34   :  { %2633 = vmatpush3.msra.mxu0 %v3133_v28 }
0x1d35   :  { %2634 = vmatprep.subr.mxu0 %v2787_v4 }
0x1d36   :  { %2635 = vmatpush3.msra.mxu0 %v3140_v20 }
0x1d37   :  { %2650 = vmatprep.subr.mxu0 %v2787_v4 }
0x1def   :  { %v1802_v25 = vpop.f32.mrf.mxu0 }
0x1df0   :  { %v1803_v29 = vadd.f32 %v3180_v36, %v1802_v25 }
0x1df1   :  { %v2616_v30 = vpop.f32.mrf.mxu0 }
0x1df2   :  { %1814 = vrot.lane.b32.xlu0 %v1803_v29, %s2789_s15  ;;  %v1806_v31 = vadd.f32 %v1803_v29, %v1730_v2  ;;  %v2036_v29 = vld [vmem:[#allocation3 + $0x38] sm:$0xff] }
0x1df4   :  { %v2316_v32 = vmul.f32 -1.442695, %v1806_v31 }
0x1df6   :  { %2741 = vpow2.f32 %v2316_v32 }
0x1e03   :  { %v2742_v33 = vpop.eup %2741 }
0x1e04   :  { %v1810_v34 = vadd.f32 1.0, %v2742_v33 }
0x1e06   :  { %2743 = vrcp.f32 %v1810_v34 }
0x1e13   :  { %v2744_v5 = vpop.eup %2743 }
0x1e14   :  { %v1824_v39 = vsub.f32 1.0, %v2744_v5  ;;  %v1830_v41 = vmul.f32 %v2744_v5, %v1729_v23 }
0x1e64   :  { %v1815_v35 = vpop.permute.xlu0 %1814 }
0x1e65   :  { %v1817_v8 = vmul.f32 %v2744_v5, %v1815_v35 }
0x1e67   :  { %1819 = vrot.lane.b32.xlu1 %v1817_v8, %s2789_s15 }
0x1ed9   :  { %v1820_v37 = vpop.permute.xlu1 %1819 }
0x1eda   :  { %v1822_v11 = vadd.f32 %v1820_v37, %v1730_v2  ;;  %v2147_v37 = vld [vmem:[%s3326_s6 + $0x10] sm:$0xff] }
0x1edc   :  { %2745 = vtanh.f32 %v1822_v11  ;;  %v2146_v11 = vld [vmem:[%s3326_s6 + $0x8] sm:$0xff] }
0x1ee9   :  { %v2746_v38 = vpop.eup %2745 }
0x1eea   :  { %1826 = vrot.lane.b32.xlu0 %v2746_v38, %s2790_s16 }
0x1f5c   :  { %v1827_v40 = vpop.permute.xlu0 %1826 }
0x1f5d   :  { %v1829_v42 = vmul.f32 %v1827_v40, %v1824_v39  ;;  %v2145_v39 = vld [vmem:[%s3326_s6] sm:$0xff] }
0x1f5f   :  { %v1831_v59 = vadd.f32 %v1830_v41, %v1829_v42 }
0x1f61   :  { %1834 = vrot.lane.b32.xlu1 %v1831_v59, %s2790_s16 }
0x1fd3   :  { %v1835_v43 = vpop.permute.xlu1 %1834 }
0x1fd4   :  { %2626 = vmatmul.mubr.msk.f32.vlgmr.msra.gmra.mxu1 %vm42_vm0, %v1835_v43 }
0x1fd5   :  { %2640 = vmatpush3.msra.mxu1 %v3120_v26  ;;  %2647 = vmatprep.mubr.msk.f32.mxu1 %vm2788_vm1, %v2787_v4  ;;  %v1832_v26 = vld [vmem:[#allocation3 + $0x28] sm:$0xff] }
0x1fd6   :  { %2641 = vmatprep.subr.mxu1 %v2787_v4 }
0x1fd7   :  { %2642 = vmatpush3.msra.mxu1 %v3126_v27 }
0x1fd8   :  { %2643 = vmatprep.subr.mxu1 %v2787_v4 }
0x1fd9   :  { %2644 = vmatpush3.msra.mxu1 %v3133_v28 }
0x1fda   :  { %2645 = vmatprep.subr.mxu1 %v2787_v4 }
0x1fdb   :  { %2646 = vmatpush3.msra.mxu1 %v3140_v20 }
0x2094   :  { %v1904_v44 = vpop.f32.mrf.mxu1 }
0x2095   :  { %v1905_v45 = vadd.f32 %v3180_v36, %v1904_v44 }
0x2096   :  { %v2627_v46 = vpop.f32.mrf.mxu1 }
0x2097   :  { %1916 = vrot.lane.b32.xlu0 %v1905_v45, %s2789_s15  ;;  %v1908_v47 = vadd.f32 %v1905_v45, %v1832_v26 }
0x2099   :  { %v2318_v48 = vmul.f32 -1.442695, %v1908_v47 }
0x209b   :  { %2747 = vpow2.f32 %v2318_v48 }
0x20a8   :  { %v2748_v49 = vpop.eup %2747 }
0x20a9   :  { %v1912_v27 = vadd.f32 1.0, %v2748_v49 }
0x20ab   :  { %2749 = vrcp.f32 %v1912_v27 }
0x20b8   :  { %v2750_v50 = vpop.eup %2749 }
0x20b9   :  { %v1926_v54 = vsub.f32 1.0, %v2750_v50  ;;  %v1932_v56 = vmul.f32 %v2750_v50, %v1831_v59 }
0x2109   :  { %v1917_v51 = vpop.permute.xlu0 %1916 }
0x210a   :  { %v1919_v28 = vmul.f32 %v2750_v50, %v1917_v51 }
0x210c   :  { %1921 = vrot.lane.b32.xlu1 %v1919_v28, %s2789_s15 }
0x217e   :  { %v1922_v52 = vpop.permute.xlu1 %1921 }
0x217f   :  { %v1924_v20 = vadd.f32 %v1922_v52, %v1832_v26 }
0x2181   :  { %2751 = vtanh.f32 %v1924_v20 }
0x218e   :  { %v2752_v53 = vpop.eup %2751 }
0x218f   :  { %1928 = vrot.lane.b32.xlu0 %v2752_v53, %s2790_s16 }
0x2201   :  { %v1929_v55 = vpop.permute.xlu0 %1928 }
0x2202   :  { %v1931_v57 = vmul.f32 %v1929_v55, %v1926_v54 }
0x2204   :  { %v1933_v58 = vadd.f32 %v1932_v56, %v1931_v57 }
0x2206   :  { %1936 = vrot.lane.b32.xlu1 %v1933_v58, %s2790_s16 }
0x2278   :  { %v1937_v60 = vpop.permute.xlu1 %1936 }
0x2279   :  { %2637 = vmatmul.mubr.msk.f32.vlgmr.msra.gmra.mxu0 %vm42_vm0, %v1937_v60 }
0x227a   :  { %2658 = vmatprep.mubr.msk.f32.mxu0 %vm2788_vm1, %v2787_v4 }
0x2339   :  { %v2006_v15 = vpop.f32.mrf.mxu0 }
0x233a   :  { %v2007_v61 = vadd.f32 %v3180_v36, %v2006_v15 }
0x233b   :  { %v2638_v62 = vpop.f32.mrf.mxu0 }
0x233c   :  { %2018 = vrot.lane.b32.xlu0 %v2007_v61, %s2789_s15  ;;  %v2010_v0 = vadd.f32 %v2007_v61, %v1934_v63 }
0x233e   :  { %v2320_v1 = vmul.f32 -1.442695, %v2010_v0 }
0x2340   :  { %2753 = vpow2.f32 %v2320_v1 }
0x234d   :  { %v2754_v3 = vpop.eup %2753 }
0x234e   :  { %v2014_v6 = vadd.f32 1.0, %v2754_v3 }
0x2350   :  { %2755 = vrcp.f32 %v2014_v6 }
0x235d   :  { %v2756_v7 = vpop.eup %2755 }
0x235e   :  { %v2028_v16 = vsub.f32 1.0, %v2756_v7  ;;  %v2034_v18 = vmul.f32 %v2756_v7, %v1933_v58 }
0x23ae   :  { %v2019_v9 = vpop.permute.xlu0 %2018 }
0x23af   :  { %v2021_v10 = vmul.f32 %v2756_v7, %v2019_v9 }
0x23b1   :  { %2023 = vrot.lane.b32.xlu1 %v2021_v10, %s2789_s15 }
0x2423   :  { %v2024_v12 = vpop.permute.xlu1 %2023 }
0x2424   :  { %v2026_v13 = vadd.f32 %v2024_v12, %v1934_v63 }
0x2426   :  { %2757 = vtanh.f32 %v2026_v13 }
0x2433   :  { %v2758_v14 = vpop.eup %2757 }
0x2434   :  { %2030 = vrot.lane.b32.xlu0 %v2758_v14, %s2790_s16 }
0x24a6   :  { %v2031_v17 = vpop.permute.xlu0 %2030 }
0x24a7   :  { %v2033_v19 = vmul.f32 %v2031_v17, %v2028_v16 }
0x24a9   :  { %v2035_v21 = vadd.f32 %v2034_v18, %v2033_v19 }
0x24ab   :  { %2038 = vrot.lane.b32.xlu1 %v2035_v21, %s2790_s16 }
0x251d   :  { %v2039_v22 = vpop.permute.xlu1 %2038 }
0x251e   :  { %2648 = vmatmul.mubr.msk.f32.vlgmr.msra.gmra.mxu1 %vm42_vm0, %v2039_v22 }
0x25de   :  { %v2108_v23 = vpop.f32.mrf.mxu1 }
0x25df   :  { %v2109_v24 = vadd.f32 %v3180_v36, %v2108_v23  ;;  %v2148_v36 = vld [vmem:[%s3326_s6 + $0x18] sm:$0xff]  ;;  %s2765_s6 = scalar_lea.vmem %s2241_s11, 256 }
0x25e0   :  { %v2649_v25 = vpop.f32.mrf.mxu1  ;;  %2651 = vmatpush3.msra.mxu0 %v2148_v36  ;;  %p2766_p0 = scmp.ne.s32.totalorder %s2241_s11, %s2765_s6  ;;  %p2771_p2 = scmp.lt.s32.totalorder %s2765_s6, %s2765_s6 }
0x25e1   :  { %2120 = vrot.lane.b32.xlu0 %v2109_v24, %s2789_s15  ;;  %v2112_v30 = vadd.f32 %v2109_v24, %v2036_v29  ;;  %2652 = vmatprep.subr.mxu0 %v2787_v4 }
0x25e2   :  { %2653 = vmatpush3.msra.mxu0 %v2147_v37  ;;  %p2772_p3 = por %p2771_p2, %p2770_p1 }
0x25e3   :  { %v2322_v2 = vmul.f32 -1.442695, %v2112_v30  ;;  %2654 = vmatprep.subr.mxu0 %v2787_v4 }
0x25e4   :  { %2655 = vmatpush3.msra.mxu0 %v2146_v11  ;;  %p2773_p4 = pnand %p2772_p3, %p2766_p0 }
0x25e5   :  { %2759 = vpow2.f32 %v2322_v2  ;;  %2656 = vmatprep.subr.mxu0 %v2787_v4 }
0x25e6   :  { %2657 = vmatpush3.msra.mxu0 %v2145_v39 }
0x25f2   :  { %v2760_v31 = vpop.eup %2759 }
0x25f3   :  { %v2116_v32 = vadd.f32 1.0, %v2760_v31 }
0x25f5   :  { %2761 = vrcp.f32 %v2116_v32 }
0x2602   :  { %v2762_v33 = vpop.eup %2761 }
0x2603   :  { %v2130_v40 = vsub.f32 1.0, %v2762_v33  ;;  %v2136_v42 = vmul.f32 %v2762_v33, %v2035_v21 }
0x2653   :  { %v2121_v34 = vpop.permute.xlu0 %2120 }
0x2654   :  { %v2123_v5 = vmul.f32 %v2762_v33, %v2121_v34 }
0x2656   :  { %2125 = vrot.lane.b32.xlu1 %v2123_v5, %s2789_s15 }
0x26c8   :  { %v2126_v35 = vpop.permute.xlu1 %2125 }
0x26c9   :  { %v2128_v8 = vadd.f32 %v2126_v35, %v2036_v29 }
0x26cb   :  { %2763 = vtanh.f32 %v2128_v8 }
0x26d8   :  { %v2764_v38 = vpop.eup %2763 }
0x26d9   :  { %2132 = vrot.lane.b32.xlu0 %v2764_v38, %s2790_s16 }
0x274b   :  { %v2133_v41 = vpop.permute.xlu0 %2132 }
0x274c   :  { %v2135_v59 = vmul.f32 %v2133_v41, %v2130_v40 }
0x274e   :  { %v2137_v43 = vadd.f32 %v2136_v42, %v2135_v59 }
0x2750   :  { %2139 = vrot.lane.b32.xlu0 %v2137_v43, %s2790_s16  ;;  %v2144_v44 = vmax.f32 %v2137_v43, 0.0 }
0x2752   :  { %2157 = vrot.lane.b32.xlu1 %v2144_v44, %s2790_s16 }
0x27c2   :  { %v2140_v45 = vpop.permute.xlu0 %2139 }
0x27c3   :  { %2143 = vst.msk [vmem:[#allocation5 + $0x8] sm:$0xff] %vm42_vm0, %v2140_v45 }
0x27c4   :  { %v2158_v4 = vpop.permute.xlu1 %2157 }
0x27c5   :  { %2659 = vmatmul.mubr.msk.f32.vlgmr.msra.gmra.mxu0 %vm42_vm0, %v2158_v4 }
0x27c6   :  { %2776 = shalt.err (!%p2773_p4)
}
0x27c7   :  { %s2793_s12 = smov 128   ;;  %s2794_s13 = smov 8   ;;  %v2323_v46 = vld [vmem:[#allocation4] ss:$0 sm:$0xff]  ;;  %vm2231_vm3 = vcmask 7168  }
0x27c8   :  { %2246 = dma.vmem_to_hbm [thread:$0]  %s2241_s11, 256, %s3329_s9, [#allocation6], %s2793_s12, %s2793_s12, %s2794_s13  }
0x2885   :  { %v2227_v26 = vpop.f32.mrf.mxu0 }
0x2886   :  { %v2228_v47 = vadd.f32 %v2323_v46, %v2227_v26 }
0x2887   :  { %v2660_v48 = vpop.f32.mrf.mxu0 }
0x2888   :  { %2232 = vst.msk [vmem:[%s3328_s8] sm:$0xff] %vm2231_vm3, %v2228_v47 }
0x2889   :  { %2785 = dma.done.wait [#allocation6], 256  }
0x288a   :  { %2786 = vsyncadd [#allocation6], 4294967040 }
0x288b   :  { %2252 = vsyncpa [#allocation6], 1 }

</bundles_post_ra>
